<compile_context>
chip_gen: v7x
topology: tpu7x:2x2x1
jax: 0.10.0
libtpu: 0.0.40
codegen_flags: <defaults>
</compile_context>

<pallas_src>
import functools
import math

import jax
import jax.numpy as jnp
from jax import lax
from jax.experimental import pallas as pl
from jax.experimental.pallas import tpu as pltpu


def _rds_kernel(x_ref, w1_ref, alpha_ref, w2_ref, o_ref, blur_ref, *, H, W, C, C2):
    """One grid step == one image.

    x_ref:     (1, H*W, C)  NHWC input flattened over (H, W); channels on lanes.
    w1_ref:    (3, 3*C, C)  conv1 taps, [dy, dx*C + c_in, c_out].
    alpha_ref: (1,) SMEM    PReLU parameter (single shared nn.PReLU() parameter).
    w2_ref:    (C, C2)      conv2 1x1 weights (pre-scaled by the 1/16 blur norm).
    o_ref:     (1, Ho*Wo, C2)
    blur_ref:  (Ho, 2*W, C) f32 scratch staging the blurred activation so that both
                            stride-2 decimations become one strided sublane read.
    """
    Ho, Wo = H // 2, W // 2
    N = H * W

    x = x_ref[0]                                               # (N, C)

    # Border masks (single iota): zero padding for conv1, reflect fix-ups for the blur.
    i = lax.broadcasted_iota(jnp.int32, (N, 1), 0)
    col = i % W
    at_x0, at_xl = col == 0, col == W - 1
    at_y0, at_yl = i < W, i >= (H - 1) * W

    zero = jnp.zeros((), x.dtype)

    # ---- conv1: 3x3, stride 1, zero pad 1 -----------------------------------
    # dx taps via sublane rolls (+ zero mask at the left/right image border),
    # packed onto the lane axis -> contraction depth 3C per dy tap.
    x_m1 = jnp.where(at_x0, zero, pltpu.roll(x, 1, 0))          # x[y, x-1]
    x_p1 = jnp.where(at_xl, zero, pltpu.roll(x, N - 1, 0))      # x[y, x+1]
    xw = jnp.concatenate([x_m1, x, x_p1], axis=1)               # (N, 3C)

    xw_up = jnp.where(at_y0, zero, pltpu.roll(xw, W, 0))        # row y-1
    xw_dn = jnp.where(at_yl, zero, pltpu.roll(xw, N - W, 0))    # row y+1

    acc = jnp.dot(xw_up, w1_ref[0], preferred_element_type=jnp.float32)
    acc = acc + jnp.dot(xw, w1_ref[1], preferred_element_type=jnp.float32)
    acc = acc + jnp.dot(xw_dn, w1_ref[2], preferred_element_type=jnp.float32)

    # ---- PReLU (single shared parameter read from SMEM) ----------------------
    a = alpha_ref[0].astype(jnp.float32)
    act = jnp.where(acc > 0, acc, acc * a)                      # (N, C) f32

    # ---- anti-alias blur: reflect pad 1, separable [1,2,1], stride 2 ---------
    # Both passes run at full resolution (cheap VPU work); the 1/16 normalization
    # is folded into w2.  Only (even y, even x) samples are kept, so the
    # bottom/right wrap-arounds never reach the output; top/left reflections are
    # fixed up explicitly.
    act_dn = pltpu.roll(act, N - W, 0)                          # act[y+1]
    act_up = jnp.where(at_y0, act_dn, pltpu.roll(act, W, 0))    # act[y-1]; y=-1 -> 1
    vb = act_up + 2.0 * act + act_dn                            # vertical pass

    vb_r = pltpu.roll(vb, N - 1, 0)                             # vb[y, x+1]
    vb_l = jnp.where(at_x0, vb_r, pltpu.roll(vb, 1, 0))         # vb[y, x-1]; x=-1 -> 1
    hb = vb_l + 2.0 * vb + vb_r                                 # horizontal pass (N, C)

    # ---- stride-2 decimation in both dims via one strided sublane read --------
    # Viewed as (Ho, 2*W, C), the kept samples (even y, even x) are exactly the
    # even positions of the first W entries along the middle axis.
    blur_ref[...] = hb.reshape(Ho, 2 * W, C)
    dec = blur_ref[:, pl.ds(0, Wo, stride=2), :]                # (Ho, Wo, C)

    # ---- conv2: 1x1, C -> C2, one MXU matmul + one dense store ----------------
    y = jnp.dot(dec.reshape(Ho * Wo, C), w2_ref[...],
                preferred_element_type=jnp.float32)
    o_ref[0] = y.astype(o_ref.dtype)


def _vmem_limit_bytes():
    """~3/4 of physical VMEM, capped: ~96 MiB on v5e/v6e, ~48 MiB on v7x."""
    try:
        cap = pltpu.get_tpu_info().vmem_capacity_bytes
    except Exception:
        cap = 64 * 1024 * 1024
    return int(min(cap * 3 // 4, 100 * 1024 * 1024))


@jax.jit
def residual_downsample(x, conv1_w, prelu_alpha, conv2_w):
    """x: (B, C, H, W) NCHW (PyTorch layout). Returns (B, 2C, H/2, W/2)."""
    B, C, H, W = x.shape
    assert H % 2 == 0 and W % 2 == 0, "even spatial dims expected (stride-2 downsample)"
    Ho, Wo = H // 2, W // 2
    C2 = conv2_w.shape[0]

    # Layout plumbing (interface is NCHW): one transpose to channels-last, then a
    # free reshape to the (B, H*W, C) slab the kernel consumes.  No HBM zero-pad
    # pass any more -- conv1's borders are masked in-kernel.
    x_slab = jnp.transpose(x, (0, 2, 3, 1)).reshape(B, H * W, C)

    # conv1 weights (Cout, Cin, 3, 3) -> (dy, dx*Cin + ci, Cout)
    w1_taps = jnp.transpose(conv1_w, (2, 3, 1, 0)).reshape(3, 3 * C, C)
    # conv2 weights (C2, C, 1, 1) -> (C, C2), with the 1/16 blur scale folded in.
    w2_mat = jnp.transpose(conv2_w.reshape(C2, C), (1, 0)) * (1.0 / 16.0)
    alpha = jnp.reshape(prelu_alpha, (1,)).astype(jnp.float32)

    kernel = functools.partial(_rds_kernel, H=H, W=W, C=C, C2=C2)

    itemsize = x.dtype.itemsize
    flops = B * (2 * H * W * 9 * C * C          # conv1 (3 matmuls, K = 3C)
                 + 10 * H * W * C               # PReLU + separable blur (VPU)
                 + 2 * Ho * Wo * C * C2)        # conv2
    bytes_accessed = (itemsize * (x_slab.size + B * Ho * Wo * C2)
                      + 4 * (w1_taps.size + w2_mat.size + 1))

    out_flat = pl.pallas_call(
        kernel,
        out_shape=jax.ShapeDtypeStruct((B, Ho * Wo, C2), x.dtype),
        grid_spec=pltpu.PrefetchScalarGridSpec(
            num_scalar_prefetch=0,
            grid=(B,),
            in_specs=[
                pl.BlockSpec((1, H * W, C), lambda b: (b, 0, 0)),       # x
                pl.BlockSpec((3, 3 * C, C), lambda b: (0, 0, 0)),       # conv1 taps
                pl.BlockSpec(memory_space=pltpu.MemorySpace.SMEM),      # PReLU alpha
                pl.BlockSpec((C, C2), lambda b: (0, 0)),                # conv2
            ],
            out_specs=pl.BlockSpec((1, Ho * Wo, C2), lambda b: (b, 0, 0)),
            scratch_shapes=[pltpu.VMEM((Ho, 2 * W, C), jnp.float32)],
        ),
        compiler_params=pltpu.CompilerParams(
            dimension_semantics=("parallel",),
            vmem_limit_bytes=_vmem_limit_bytes(),
        ),
        cost_estimate=pl.CostEstimate(
            flops=flops, transcendentals=0, bytes_accessed=bytes_accessed),
    )(x_slab, w1_taps, alpha, w2_mat)

    out = out_flat.reshape(B, Ho, Wo, C2)
    return jnp.transpose(out, (0, 3, 1, 2))      # back to NCHW


def reference(x, conv1_w, prelu_alpha, conv2_w):
    """Pure-JAX reference matching the PyTorch module semantics."""
    C = x.shape[1]
    dn = ("NCHW", "OIHW", "NCHW")
    y = lax.conv_general_dilated(x, conv1_w, (1, 1), ((1, 1), (1, 1)),
                                 dimension_numbers=dn)
    y = jnp.where(y > 0, y, prelu_alpha * y)
    yp = jnp.pad(y, ((0, 0), (0, 0), (1, 1), (1, 1)), mode="reflect")
    f1 = jnp.array([1.0, 2.0, 1.0], jnp.float32)
    filt = (f1[:, None] * f1[None, :]) / 16.0
    filt = jnp.tile(filt[None, None], (C, 1, 1, 1))              # (C, 1, 3, 3) depthwise
    y = lax.conv_general_dilated(yp, filt, (2, 2), "VALID",
                                 dimension_numbers=dn, feature_group_count=C)
    y = lax.conv_general_dilated(y, conv2_w, (1, 1), "VALID",
                                 dimension_numbers=dn)
    return y.astype(x.dtype)


if __name__ == "__main__":
    # Small shapes consistent with the module: batch=2, channels=4, spatial=16x16.
    B, C, H, W = 2, 4, 16, 16

    key = jax.random.PRNGKey(0)
    kx, k1, k2 = jax.random.split(key, 3)

    x = jax.random.normal(kx, (B, C, H, W), dtype=jnp.float32)
    conv1_w = jax.random.normal(k1, (C, C, 3, 3), dtype=jnp.float32) / math.sqrt(9 * C)
    conv2_w = jax.random.normal(k2, (2 * C, C, 1, 1), dtype=jnp.float32) / math.sqrt(C)
    prelu_alpha = jnp.float32(0.25)          # nn.PReLU() default init (1 shared param)

    out = residual_downsample(x, conv1_w, prelu_alpha, conv2_w)
    out = jax.block_until_ready(out)

    ref = reference(x, conv1_w, prelu_alpha, conv2_w)
    assert out.shape == (B, 2 * C, H // 2, W // 2), out.shape
    max_err = float(jnp.max(jnp.abs(out - ref)))
    assert jnp.allclose(out, ref, atol=1e-4, rtol=1e-4), max_err

    print("KERNEL_OK")
</pallas_src>

<mosaic_0001>
module attributes {stable_mosaic.version = 11 : i64} {
  func.func @_rds_kernel(%arg0: i32, %arg1: memref<1x256x4xf32, #tpu.memory_space<vmem>>, %arg2: memref<3x12x4xf32, #tpu.memory_space<vmem>>, %arg3: memref<1xf32, #tpu.memory_space<smem>>, %arg4: memref<4x8xf32, #tpu.memory_space<vmem>>, %arg5: memref<1x64x8xf32, #tpu.memory_space<vmem>>, %arg6: memref<8x32x4xf32, #tpu.memory_space<vmem>>) attributes {dimension_semantics = [#tpu.dimension_semantics<parallel>], iteration_bounds = array<i64: 2>, scalar_prefetch = 0 : i64, scratch_operands = 1 : i64, tpu.core_type = #tpu.core_type<tc>, window_params = [{transform_indices = @transform_0, window_bounds = array<i64: 1, 256, 4>}, {pipeline_mode = #tpu.pipeline_mode<synchronous>, transform_indices = @transform_1, window_bounds = array<i64: 3, 12, 4>}, {transform_indices = @transform_2, window_bounds = array<i64: 1>}, {pipeline_mode = #tpu.pipeline_mode<synchronous>, transform_indices = @transform_3, window_bounds = array<i64: 4, 8>}, {transform_indices = @transform_4, window_bounds = array<i64: 1, 64, 8>}]} {
    %c0 = arith.constant 0 : index
    %c0_0 = arith.constant 0 : index
    %c0_1 = arith.constant 0 : index
    %0 = vector.load %arg1[%c0, %c0_0, %c0_1] : memref<1x256x4xf32, #tpu.memory_space<vmem>>, vector<1x256x4xf32>
    %1 = vector.shape_cast %0 : vector<1x256x4xf32> to vector<256x4xf32>
    %2 = tpu.iota {dimensions = array<i32: 0>} : vector<256x1xi32>
    %c16_i32 = arith.constant 16 : i32
    %c0_i32 = arith.constant 0 : i32
    %3 = arith.cmpi eq, %c16_i32, %c0_i32 : i32
    %c1_i32 = arith.constant 1 : i32
    %4 = arith.select %3, %c1_i32, %c16_i32 : i32
    %5 = vector.broadcast %4 : i32 to vector<256x1xi32>
    %6 = arith.remsi %2, %5 : vector<256x1xi32>
    %c0_i32_2 = arith.constant 0 : i32
    %7 = vector.broadcast %c0_i32_2 : i32 to vector<256x1xi32>
    %8 = arith.cmpi ne, %6, %7 : vector<256x1xi32>
    %c0_i32_3 = arith.constant 0 : i32
    %9 = vector.broadcast %c0_i32_3 : i32 to vector<256x1xi32>
    %10 = arith.cmpi slt, %6, %9 : vector<256x1xi32>
    %c0_i32_4 = arith.constant 0 : i32
    %11 = arith.cmpi slt, %4, %c0_i32_4 : i32
    %12 = vector.broadcast %11 : i1 to vector<256x1xi1>
    %13 = vector.broadcast %12 : vector<256x1xi1> to vector<256x1xi1>
    %14 = arith.xori %10, %13 : vector<256x1xi1>
    %15 = arith.andi %14, %8 : vector<256x1xi1>
    %16 = vector.broadcast %4 : i32 to vector<256x1xi32>
    %17 = arith.addi %6, %16 : vector<256x1xi32>
    %18 = arith.select %15, %17, %6 : vector<256x1xi1>, vector<256x1xi32>
    %c0_i32_5 = arith.constant 0 : i32
    %19 = vector.broadcast %c0_i32_5 : i32 to vector<256x1xi32>
    %20 = arith.cmpi eq, %18, %19 : vector<256x1xi32>
    %c15_i32 = arith.constant 15 : i32
    %21 = vector.broadcast %c15_i32 : i32 to vector<256x1xi32>
    %22 = arith.cmpi eq, %18, %21 : vector<256x1xi32>
    %c16_i32_6 = arith.constant 16 : i32
    %23 = vector.broadcast %c16_i32_6 : i32 to vector<256x1xi32>
    %24 = arith.cmpi slt, %2, %23 : vector<256x1xi32>
    %c240_i32 = arith.constant 240 : i32
    %25 = vector.broadcast %c240_i32 : i32 to vector<256x1xi32>
    %26 = arith.cmpi sge, %2, %25 : vector<256x1xi32>
    %c1_i32_7 = arith.constant 1 : i32
    %27 = tpu.dynamic_rotate %1 by %c1_i32_7 dim 0 : vector<256x4xf32>, i32 -> vector<256x4xf32>
    %cst = arith.constant 0.000000e+00 : f32
    %28 = vector.shape_cast %20 : vector<256x1xi1> to vector<256x1xi1>
    %29 = vector.broadcast %28 : vector<256x1xi1> to vector<256x4xi1>
    %30 = vector.broadcast %cst : f32 to vector<256x4xf32>
    %31 = arith.select %29, %30, %27 : vector<256x4xi1>, vector<256x4xf32>
    %c255_i32 = arith.constant 255 : i32
    %32 = tpu.dynamic_rotate %1 by %c255_i32 dim 0 : vector<256x4xf32>, i32 -> vector<256x4xf32>
    %cst_8 = arith.constant 0.000000e+00 : f32
    %33 = vector.shape_cast %22 : vector<256x1xi1> to vector<256x1xi1>
    %34 = vector.broadcast %33 : vector<256x1xi1> to vector<256x4xi1>
    %35 = vector.broadcast %cst_8 : f32 to vector<256x4xf32>
    %36 = arith.select %34, %35, %32 : vector<256x4xi1>, vector<256x4xf32>
    %37 = tpu.concatenate %31, %1, %36 in 1 : vector<256x4xf32>, vector<256x4xf32>, vector<256x4xf32> -> vector<256x12xf32>
    %c16_i32_9 = arith.constant 16 : i32
    %38 = tpu.dynamic_rotate %37 by %c16_i32_9 dim 0 : vector<256x12xf32>, i32 -> vector<256x12xf32>
    %cst_10 = arith.constant 0.000000e+00 : f32
    %39 = vector.shape_cast %24 : vector<256x1xi1> to vector<256x1xi1>
    %40 = vector.broadcast %39 : vector<256x1xi1> to vector<256x12xi1>
    %41 = vector.broadcast %cst_10 : f32 to vector<256x12xf32>
    %42 = arith.select %40, %41, %38 : vector<256x12xi1>, vector<256x12xf32>
    %c240_i32_11 = arith.constant 240 : i32
    %43 = tpu.dynamic_rotate %37 by %c240_i32_11 dim 0 : vector<256x12xf32>, i32 -> vector<256x12xf32>
    %cst_12 = arith.constant 0.000000e+00 : f32
    %44 = vector.shape_cast %26 : vector<256x1xi1> to vector<256x1xi1>
    %45 = vector.broadcast %44 : vector<256x1xi1> to vector<256x12xi1>
    %46 = vector.broadcast %cst_12 : f32 to vector<256x12xf32>
    %47 = arith.select %45, %46, %43 : vector<256x12xi1>, vector<256x12xf32>
    %c0_13 = arith.constant 0 : index
    %c0_14 = arith.constant 0 : index
    %c0_15 = arith.constant 0 : index
    %48 = vector.load %arg2[%c0_13, %c0_14, %c0_15] : memref<3x12x4xf32, #tpu.memory_space<vmem>>, vector<1x12x4xf32>
    %49 = vector.shape_cast %48 : vector<1x12x4xf32> to vector<12x4xf32>
    %cst_16 = arith.constant dense<0.000000e+00> : vector<256x4xf32>
    %50 = tpu.matmul %42, %49, %cst_16 {dimension_numbers = #tpu.dot_dimension_numbers<[1], [0], [0], [1], [0, 0, 1, 1], [], []>} : vector<256x12xf32>, vector<12x4xf32>, vector<256x4xf32> -> vector<256x4xf32>
    %c1 = arith.constant 1 : index
    %c0_17 = arith.constant 0 : index
    %c0_18 = arith.constant 0 : index
    %51 = vector.load %arg2[%c1, %c0_17, %c0_18] : memref<3x12x4xf32, #tpu.memory_space<vmem>>, vector<1x12x4xf32>
    %52 = vector.shape_cast %51 : vector<1x12x4xf32> to vector<12x4xf32>
    %cst_19 = arith.constant dense<0.000000e+00> : vector<256x4xf32>
    %53 = tpu.matmul %37, %52, %cst_19 {dimension_numbers = #tpu.dot_dimension_numbers<[1], [0], [0], [1], [0, 0, 1, 1], [], []>} : vector<256x12xf32>, vector<12x4xf32>, vector<256x4xf32> -> vector<256x4xf32>
    %54 = arith.addf %50, %53 : vector<256x4xf32>
    %c2 = arith.constant 2 : index
    %c0_20 = arith.constant 0 : index
    %c0_21 = arith.constant 0 : index
    %55 = vector.load %arg2[%c2, %c0_20, %c0_21] : memref<3x12x4xf32, #tpu.memory_space<vmem>>, vector<1x12x4xf32>
    %56 = vector.shape_cast %55 : vector<1x12x4xf32> to vector<12x4xf32>
    %cst_22 = arith.constant dense<0.000000e+00> : vector<256x4xf32>
    %57 = tpu.matmul %47, %56, %cst_22 {dimension_numbers = #tpu.dot_dimension_numbers<[1], [0], [0], [1], [0, 0, 1, 1], [], []>} : vector<256x12xf32>, vector<12x4xf32>, vector<256x4xf32> -> vector<256x4xf32>
    %58 = arith.addf %54, %57 : vector<256x4xf32>
    %c0_23 = arith.constant 0 : index
    %59 = memref.load %arg3[%c0_23] : memref<1xf32, #tpu.memory_space<smem>>
    %cst_24 = arith.constant 0.000000e+00 : f32
    %60 = vector.broadcast %cst_24 : f32 to vector<256x4xf32>
    %61 = arith.cmpf ogt, %58, %60 : vector<256x4xf32>
    %62 = vector.broadcast %59 : f32 to vector<256x4xf32>
    %63 = arith.mulf %58, %62 : vector<256x4xf32>
    %64 = arith.select %61, %58, %63 : vector<256x4xi1>, vector<256x4xf32>
    %c240_i32_25 = arith.constant 240 : i32
    %65 = tpu.dynamic_rotate %64 by %c240_i32_25 dim 0 : vector<256x4xf32>, i32 -> vector<256x4xf32>
    %c16_i32_26 = arith.constant 16 : i32
    %66 = tpu.dynamic_rotate %64 by %c16_i32_26 dim 0 : vector<256x4xf32>, i32 -> vector<256x4xf32>
    %67 = vector.shape_cast %24 : vector<256x1xi1> to vector<256x1xi1>
    %68 = vector.broadcast %67 : vector<256x1xi1> to vector<256x4xi1>
    %69 = arith.select %68, %65, %66 : vector<256x4xi1>, vector<256x4xf32>
    %cst_27 = arith.constant 2.000000e+00 : f32
    %70 = vector.broadcast %cst_27 : f32 to vector<256x4xf32>
    %71 = arith.mulf %70, %64 : vector<256x4xf32>
    %72 = arith.addf %69, %71 : vector<256x4xf32>
    %73 = arith.addf %72, %65 : vector<256x4xf32>
    %c255_i32_28 = arith.constant 255 : i32
    %74 = tpu.dynamic_rotate %73 by %c255_i32_28 dim 0 : vector<256x4xf32>, i32 -> vector<256x4xf32>
    %c1_i32_29 = arith.constant 1 : i32
    %75 = tpu.dynamic_rotate %73 by %c1_i32_29 dim 0 : vector<256x4xf32>, i32 -> vector<256x4xf32>
    %76 = vector.shape_cast %20 : vector<256x1xi1> to vector<256x1xi1>
    %77 = vector.broadcast %76 : vector<256x1xi1> to vector<256x4xi1>
    %78 = arith.select %77, %74, %75 : vector<256x4xi1>, vector<256x4xf32>
    %cst_30 = arith.constant 2.000000e+00 : f32
    %79 = vector.broadcast %cst_30 : f32 to vector<256x4xf32>
    %80 = arith.mulf %79, %73 : vector<256x4xf32>
    %81 = arith.addf %78, %80 : vector<256x4xf32>
    %82 = arith.addf %81, %74 : vector<256x4xf32>
    %83 = vector.shape_cast %82 : vector<256x4xf32> to vector<8x32x4xf32>
    %c0_31 = arith.constant 0 : index
    %c0_32 = arith.constant 0 : index
    %c0_33 = arith.constant 0 : index
    %84 = vector.load %arg6[%c0_31, %c0_32, %c0_33] : memref<8x32x4xf32, #tpu.memory_space<vmem>>, vector<8x32x4xf32>
    tpu.vector_store %arg6[%c0_31, %c0_32, %c0_33], %83 {strides = array<i32>} : memref<8x32x4xf32, #tpu.memory_space<vmem>>, vector<8x32x4xf32>,
    %c0_34 = arith.constant 0 : index
    %c0_35 = arith.constant 0 : index
    %c0_36 = arith.constant 0 : index
    %85 = tpu.strided_load %arg6[%c0_34, %c0_35, %c0_36] {strides = array<i32: 1, 2, 1>} : memref<8x32x4xf32, #tpu.memory_space<vmem>>, vector<8x8x4xf32>
    %86 = vector.shape_cast %85 : vector<8x8x4xf32> to vector<64x4xf32>
    %c0_37 = arith.constant 0 : index
    %c0_38 = arith.constant 0 : index
    %87 = vector.load %arg4[%c0_37, %c0_38] : memref<4x8xf32, #tpu.memory_space<vmem>>, vector<4x8xf32>
    %cst_39 = arith.constant dense<0.000000e+00> : vector<64x8xf32>
    %88 = tpu.matmul %86, %87, %cst_39 {dimension_numbers = #tpu.dot_dimension_numbers<[1], [0], [0], [1], [0, 0, 1, 1], [], []>} : vector<64x4xf32>, vector<4x8xf32>, vector<64x8xf32> -> vector<64x8xf32>
    %c0_40 = arith.constant 0 : index
    %c0_41 = arith.constant 0 : index
    %c0_42 = arith.constant 0 : index
    %89 = vector.load %arg5[%c0_40, %c0_41, %c0_42] : memref<1x64x8xf32, #tpu.memory_space<vmem>>, vector<1x64x8xf32>
    %90 = vector.shape_cast %89 : vector<1x64x8xf32> to vector<64x8xf32>
    %91 = vector.shape_cast %88 : vector<64x8xf32> to vector<1x64x8xf32>
    tpu.vector_store %arg5[%c0_40, %c0_41, %c0_42], %91 {strides = array<i32>} : memref<1x64x8xf32, #tpu.memory_space<vmem>>, vector<1x64x8xf32>,
    return
  }
  func.func @transform_0(%arg0: i32) -> (i32, i32, i32) {
    %c0_i32 = arith.constant 0 : i32
    %c0_i32_0 = arith.constant 0 : i32
    %c0_i32_1 = arith.constant 0 : i32
    return %arg0, %c0_i32, %c0_i32_0 : i32, i32, i32
  }
  func.func @transform_1(%arg0: i32) -> (i32, i32, i32) {
    %c0_i32 = arith.constant 0 : i32
    %c0_i32_0 = arith.constant 0 : i32
    %c0_i32_1 = arith.constant 0 : i32
    %c0_i32_2 = arith.constant 0 : i32
    return %c0_i32, %c0_i32_0, %c0_i32_1 : i32, i32, i32
  }
  func.func @transform_2(%arg0: i32) -> i32 {
    %c0_i32 = arith.constant 0 : i32
    %c0_i32_0 = arith.constant 0 : i32
    return %c0_i32 : i32
  }
  func.func @transform_3(%arg0: i32) -> (i32, i32) {
    %c0_i32 = arith.constant 0 : i32
    %c0_i32_0 = arith.constant 0 : i32
    %c0_i32_1 = arith.constant 0 : i32
    return %c0_i32, %c0_i32_0 : i32, i32
  }
  func.func @transform_4(%arg0: i32) -> (i32, i32, i32) {
    %c0_i32 = arith.constant 0 : i32
    %c0_i32_0 = arith.constant 0 : i32
    %c0_i32_1 = arith.constant 0 : i32
    return %arg0, %c0_i32, %c0_i32_0 : i32, i32, i32
  }
}

</mosaic_0001>

<bundles_post_ra>
// kernel: residual_downsample.1
= control target key start
LH: loop header
LB: loop body
LE: loop exit
PB: predicated region body
PF: predicated region fallthrough
CT: control target
= control target key end

     0   :  { %s3889_s17 = smov 0   ;;  %s5082_s0 = inlined_call_operand.vmem [shape: f32[2,256,4], index: 0, kind: input, shape index: {}]   ;;  %s5083_s1 = inlined_call_operand.vmem [shape: f32[3,12,4], index: 1, kind: input, shape index: {}]   ;;  %s5084_s2 = inlined_call_operand.<no memory space> [shape: f32[1], index: 2, kind: input, shape index: {}]   ;;  %s5085_s3 = inlined_call_operand.vmem [shape: f32[4,8], index: 3, kind: input, shape index: {}]   ;;  %s5086_s4 = inlined_call_operand.vmem [shape: f32[2,64,8], index: 4, kind: output, shape index: {}]  }
   0x1   :  { %9 = sst [smem:[#allocation3]] %s5084_s2 }
   0x2 LB: > { %s3351_s18 = sadd.s32 4294967295, %s3855_s17   ;;  %p3355_p0 = scmp.ge.s32.totalorder %s3855_s17, 1  ;;  %s3855_s17 = sphi %s3889_s17, %s15_s17  }
   0x3   : > { %p163_p1 = scmp.lt.s32.totalorder %s3855_s17, 3 }
   0x5   : > { %p164_p2 = pnand %p3355_p0, %p163_p1 }
   0x6   : > { %p189_p3 = scmp.lt.s32.totalorder (!%p164_p2), %s3351_s18, 1  ;;  %v231_v0 = vlaneseq (!%p164_p2)  ;;  %v1612_v1 = vld [vmem:[%s5083_s1] sm:$0xff] (!%p164_p2)  ;;  %v1613_v2 = vld [vmem:[%s5083_s1 + $0x8] sm:$0xf] (!%p164_p2)  ;;  %vm1714_vm0 = vcmask (!%p164_p2), 1043456   ;;  %v3360_v4 = vld [vmem:[%s5083_s1 + $0x10] sm:$0xff] (!%p164_p2) }
   0x7   : > { %167 = sbr.rel (%p164_p2) target bundleno = 758 (0x2f6), region = 36  ;;  %v3903_v3 = vpack.c.bf16 (!%p164_p2), %v1613_v2, %v1612_v1  ;;  %vm3857_vm1 = vmmov (!%p164_p2), 1   ;;  %v3858_v7 = vmov (!%p164_p2), 0.0   ;;  %v3361_v8 = vld [vmem:[%s5083_s1 + $0x18] sm:$0xf] (!%p164_p2)  ;;  %s3859_s30 = smov (!%p164_p2), 4  }
   0x8   : > { %v3910_v5 = vshrl.u32 (!%p164_p2), %v231_v0, 7  ;;  %vm3913_vm2 = vmpackc.low (!%p164_p2), %vm1714_vm0, %vm3857_vm1  ;;  %3639 = vmatprep.mubr.f32.mxu0 (!%p164_p2), %v3858_v7  ;;  %v3753_v9 = vpack.c.bf16 (!%p164_p2), %v3361_v8, %v3360_v4  ;;  %s3860_s5 = smov (!%p164_p2), 8   ;;  %s2626_s10 = sld [smem:[#allocation3]] (!%p164_p2) }
   0x9   : > { %3761 = vmatprep.subr.msk.bf16.mxu0 (!%p164_p2), %vm3913_vm2, %v3903_v3 }
   0xa   : > { %v233_v10 = vadd.s32 (!%p164_p2), 8, %v3910_v5  ;;  %3764 = vmatpush3.bf16.msk.msra.mxu0 (!%p164_p2), %vm3913_vm2, %v3903_v3  ;;  %v235_v11 = vadd.s32 (!%p164_p2), 24, %v3910_v5  ;;  %3755 = vmatprep.subr.msk.bf16.mxu1 (!%p164_p2), %vm3913_vm2, %v3753_v9  ;;  %vm969_vm3 = vcmp.lt.s32.totalorder (!%p164_p2), %v3910_v5, 7  ;;  %v237_v28 = vadd.s32 (!%p164_p2), 40, %v3910_v5 }
   0xb   : > { %3758 = vmatpush3.bf16.msk.msra.mxu1 (!%p164_p2), %vm3913_vm2, %v3753_v9  ;;  %v239_v37 = vadd.s32 (!%p164_p2), 56, %v3910_v5  ;;  %v241_v47 = vadd.s32 (!%p164_p2), 72, %v3910_v5  ;;  %vm808_vm8 = vcmp.lt.s32.totalorder (!%p164_p2), %v3910_v5, 1  ;;  %v243_v61 = vadd.s32 (!%p164_p2), 88, %v3910_v5 }
   0xc   : > { %v275_v15 = vand.u32 (!%p164_p2), 15, %v233_v10  ;;  %3771 = vmatprep.subr.msk.bf16.mxu1 (!%p164_p2), %vm3913_vm2, %v3903_v3  ;;  %v289_v22 = vand.u32 (!%p164_p2), 15, %v235_v11  ;;  %v303_v34 = vand.u32 (!%p164_p2), 15, %v237_v28 }
   0xd   : > { %3640 = vmatmul.mubr.f32.vlgmr.msra.gmra.mrb[0].mxu0 (!%p164_p2), %v3858_v7  ;;  %v317_v43 = vand.u32 (!%p164_p2), 15, %v239_v37  ;;  %v331_v55 = vand.u32 (!%p164_p2), 15, %v241_v47 }
   0xe   : > { %s5124_s18 = smov (!%p189_p3, %s3351_s18), 1  ;;  %vm681_vm4 = vcmp.eq.s32.totalorder %v275_v15, 15  ;;  %vm683_vm5 = vcmp.eq.s32.totalorder %v289_v22, 15  ;;  %vm685_vm6 = vcmp.eq.s32.totalorder %v303_v34, 15  ;;  %v245_v22 = vadd.s32 104, %v3910_v5 }
   0xf   : > { %s3470_s26 = sshll.u32 %s5124_s18, 8  ;;  %vm4014_vm7 = vcmp.eq.s32.totalorder %v317_v43, 15  ;;  %vm4044_vm9 = vcmp.eq.s32.totalorder %v331_v55, 15  ;;  %v3427_v43 = vld [vmem:[%s5083_s1 + $0x28] sm:$0xf]  ;;  %s3471_s13 = sshll.u32 %s5124_s18, 6 }
  0x10   : > { %s3932_s29 = scalar_lea.vmem %s5082_s0, %s3470_s26  ;;  %s198_s16 = scalar_lea.vmem %s5086_s4, %s3471_s13 }
  0x11   : > { %v3938_v12 = vld [vmem:[%s3932_s29 + $0x18] sm:$0xff]  ;;  %v3941_v13 = vld [vmem:[%s3932_s29] sm:$0xff]  ;;  %v3944_v14 = vld [vmem:[%s3932_s29 + $0x8] sm:$0xff] }
  0x12   : > { %1136 = vrot.lane.b32.xlu1 %v3938_v12, %s3859_s30  ;;  %1130 = vrot.lane.b32.xlu0 %v3941_v13, %s3859_s30  ;;  %v937_v16 = vrot.slane %v3941_v13, 1  ;;  %v3955_v17 = vld [vmem:[%s3932_s29 + $0x10] sm:$0xff]  ;;  %v3958_v18 = vld [vmem:[%s3932_s29 + $0x20] sm:$0xff]  ;;  %v938_v19 = vrot.slane %v3944_v14, 1  ;;  %v940_v21 = vrot.slane %v3938_v12, 1  ;;  %v779_v50 = vrot.slane %v3938_v12, 7 }
  0x13   : > { %v939_v20 = vrot.slane %v3955_v17, 1  ;;  %v941_v23 = vrot.slane %v3958_v18, 1  ;;  %v3981_v29 = vld [vmem:[%s3932_s29 + $0x28] sm:$0xff]  ;;  %v3984_v30 = vld [vmem:[%s3932_s29 + $0x30] sm:$0xff]  ;;  %v3999_v38 = vld [vmem:[%s3932_s29 + $0x38] sm:$0xff]  ;;  %v778_v53 = vrot.slane %v3955_v17, 7 }
  0x14   : > { %v1000_v24 = vsel %vm969_vm3, %v937_v16, %v938_v19  ;;  %v942_v33 = vrot.slane %v3981_v29, 1  ;;  %v943_v35 = vrot.slane %v3984_v30, 1  ;;  %v4002_v39 = vld [vmem:[%s3932_s29 + $0x40] sm:$0xff]  ;;  %v944_v42 = vrot.slane %v3999_v38, 1  ;;  %v4022_v48 = vld [vmem:[%s3932_s29 + $0x48] sm:$0xff]  ;;  %v4025_v49 = vld [vmem:[%s3932_s29 + $0x50] sm:$0xff] }
  0x15   : > { %v999_v25 = vsel %vm969_vm3, %v938_v19, %v939_v20  ;;  %v997_v27 = vsel %vm969_vm3, %v940_v21, %v941_v23  ;;  %v998_v31 = vsel %vm969_vm3, %v939_v20, %v940_v21  ;;  %v945_v44 = vrot.slane %v4002_v39, 1  ;;  %v210_v63 = vld [vmem:[%s3932_s29 + $0x58] sm:$0xff]  ;;  %v4057_v0 = vld [vmem:[%s3932_s29 + $0x60] sm:$0xff] }
  0x16   : > { %1132 = vrot.lane.b32.xlu0 %v3944_v14, %s3859_s30  ;;  %1258 = vrot.lane.b32.xlu1 %v1000_v24, %s3860_s5  ;;  %v1067_v26 = vsel %vm681_vm4, 0.0, %v999_v25  ;;  %v1069_v32 = vsel %vm683_vm5, 0.0, %v997_v27  ;;  %v995_v36 = vsel %vm969_vm3, %v942_v33, %v943_v35  ;;  %v996_v40 = vsel %vm969_vm3, %v941_v23, %v942_v33  ;;  %v4075_v9 = vld [vmem:[%s3932_s29 + $0xf8] sm:$0xff] }
  0x17   : > { %v1071_v41 = vsel %vm685_vm6, 0.0, %v995_v36  ;;  %v993_v46 = vsel %vm969_vm3, %v944_v42, %v945_v44  ;;  %v994_v51 = vsel %vm969_vm3, %v943_v35, %v944_v42  ;;  %v946_v54 = vrot.slane %v4022_v48, 1 }
  0x18   : > { %v1073_v52 = vsel %vm4014_vm7, 0.0, %v993_v46  ;;  %v947_v56 = vrot.slane %v4025_v49, 1  ;;  %v777_v57 = vrot.slane %v3944_v14, 7  ;;  %v776_v58 = vrot.slane %v3941_v13, 7 }
  0x19   : > { %v4053_v62 = vsel %vm808_vm8, %v778_v53, %v779_v50  ;;  %v781_v2 = vrot.slane %v3981_v29, 7  ;;  %v992_v4 = vsel %vm969_vm3, %v945_v44, %v946_v54  ;;  %v948_v11 = vrot.slane %v210_v63, 1  ;;  %v214_v44 = vld [vmem:[%s3932_s29 + $0x78] sm:$0xff] }
  0x1a   : > { %1134 = vrot.lane.b32.xlu0 %v3955_v17, %s3859_s30  ;;  %1260 = vrot.lane.b32.xlu1 %v1067_v26, %s3860_s5  ;;  %v991_v60 = vsel %vm969_vm3, %v946_v54, %v947_v56  ;;  %v4063_v1 = vsel %vm808_vm8, %v776_v58, %v777_v57  ;;  %v4079_v10 = vsel %vm808_vm8, %v777_v57, %v778_v53  ;;  %v345_v12 = vand.u32 15, %v243_v61  ;;  %v212_v26 = vld [vmem:[%s3932_s29 + $0x68] sm:$0xff] }
  0x1b   : > { %v1075_v8 = vsel %vm4044_vm9, 0.0, %v991_v60  ;;  %v949_v14 = vrot.slane %v4057_v0, 1  ;;  %v968_v15 = vrot.slane %v4075_v9, 1  ;;  %v783_v17 = vrot.slane %v3999_v38, 7  ;;  %v216_v54 = vld [vmem:[%s3932_s29 + $0x88] sm:$0xff] }
  0x1c   : > { %v780_v19 = vrot.slane %v3958_v18, 7  ;;  %v782_v20 = vrot.slane %v3984_v30, 7  ;;  %v785_v21 = vrot.slane %v4022_v48, 7  ;;  %vm4102_vm10 = vcmp.eq.s32.totalorder %v345_v12, 15 }
  0x1d   : > { %v4096_v23 = vsel %vm969_vm3, %v968_v15, %v937_v16  ;;  %v989_v25 = vsel %vm969_vm3, %v948_v11, %v949_v14  ;;  %v787_v28 = vrot.slane %v210_v63, 7  ;;  %v784_v33 = vrot.slane %v4002_v39, 7 }
  0x1e   : > { %1262 = vrot.lane.b32.xlu0 %v998_v31, %s3860_s5  ;;  %1264 = vrot.lane.b32.xlu1 %v1069_v32, %s3860_s5  ;;  %v4111_v27 = vsel %vm808_vm8, %v780_v19, %v781_v2  ;;  %v4115_v16 = vsel %vm808_vm8, %v781_v2, %v782_v20  ;;  %v990_v31 = vsel %vm969_vm3, %v947_v56, %v948_v11  ;;  %v789_v32 = vrot.slane %v212_v26, 7  ;;  %v215_v56 = vld [vmem:[%s3932_s29 + $0x80] sm:$0xff] }
  0x1f   : > { %v1077_v34 = vsel %vm4102_vm10, 0.0, %v989_v25  ;;  %v950_v35 = vrot.slane %v212_v26, 1  ;;  %v359_v36 = vand.u32 15, %v245_v22  ;;  %v786_v37 = vrot.slane %v4025_v49, 7 }
  0x20   : > { %v788_v42 = vrot.slane %v4057_v0, 7  ;;  %v791_v47 = vrot.slane %v214_v44, 7  ;;  %v247_v53 = vadd.s32 120, %v3910_v5  ;;  %v793_v57 = vrot.slane %v216_v54, 7 }
  0x21   : > { %v4149_v45 = vsel %vm808_vm8, %v785_v21, %v786_v37  ;;  %v4153_v46 = vsel %vm808_vm8, %v786_v37, %v787_v28  ;;  %vm4165_vm11 = vcmp.eq.s32.totalorder %v359_v36, 15  ;;  %v792_v61 = vrot.slane %v215_v56, 7  ;;  %v4236_v37 = vld [vmem:[%s3932_s29 + $0xa8] sm:$0xff] }
  0x22   : > { %1138 = vrot.lane.b32.xlu0 %v3958_v18, %s3859_s30  ;;  %1140 = vrot.lane.b32.xlu1 %v3981_v29, %s3859_s30  ;;  %v4100_v18 = vsel %vm808_vm8, %v779_v50, %v780_v19  ;;  %v213_v29 = vld [vmem:[%s3932_s29 + $0x70] sm:$0xff]  ;;  %v249_v19 = vadd.s32 136, %v3910_v5  ;;  %v251_v36 = vadd.s32 152, %v3910_v5  ;;  %vm1354_vm9 = vcmask 31744  }
  0x23   : > { %v790_v55 = vrot.slane %v213_v29, 7  ;;  %v4195_v11 = vsel %vm808_vm8, %v791_v47, %v792_v61  ;;  %v4199_v12 = vsel %vm808_vm8, %v792_v61, %v793_v57  ;;  %vm1387_vm10 = vcmask 64512  }
  0x25   : > { %v4181_v59 = vsel %vm808_vm8, %v789_v32, %v790_v55  ;;  %v4185_v60 = vsel %vm808_vm8, %v790_v55, %v791_v47  ;;  %v253_v55 = vadd.s32 168, %v3910_v5 }
  0x26   : > { %1266 = vrot.lane.b32.xlu0 %v996_v40, %s3860_s5  ;;  %1268 = vrot.lane.b32.xlu1 %v1071_v41, %s3860_s5  ;;  %v4133_v40 = vsel %vm808_vm8, %v783_v17, %v784_v33  ;;  %v4137_v41 = vsel %vm808_vm8, %v784_v33, %v785_v21  ;;  %v217_v21 = vld [vmem:[%s3932_s29 + $0x90] sm:$0xff] }
  0x27   : > { %v794_v24 = vrot.slane %v217_v21, 7 }
  0x29   : > { %v4220_v33 = vsel %vm808_vm8, %v793_v57, %v794_v24 }
  0x2a   : > { %1142 = vrot.lane.b32.xlu0 %v3984_v30, %s3859_s30  ;;  %1144 = vrot.lane.b32.xlu1 %v3999_v38, %s3859_s30  ;;  %v4120_v30 = vsel %vm808_vm8, %v782_v20, %v783_v17  ;;  %v951_v38 = vrot.slane %v213_v29, 1  ;;  %v218_v20 = vld [vmem:[%s3932_s29 + $0x98] sm:$0xff] }
  0x2b   : > { %v795_v22 = vrot.slane %v218_v20, 7  ;;  %v956_v47 = vrot.slane %v218_v20, 1 }
  0x2e   : > { %1270 = vrot.lane.b32.xlu0 %v994_v51, %s3860_s5  ;;  %1272 = vrot.lane.b32.xlu1 %v1073_v52, %s3860_s5  ;;  %v987_v52 = vsel %vm969_vm3, %v950_v35, %v951_v38 }
  0x2f   : > { %v1079_v2 = vsel %vm4165_vm11, 0.0, %v987_v52  ;;  %vm1617_vm11 = vcmask 97280  }
  0x32   : > { %1146 = vrot.lane.b32.xlu0 %v4002_v39, %s3859_s30  ;;  %1148 = vrot.lane.b32.xlu1 %v4022_v48, %s3859_s30  ;;  %v3426_v39 = vld [vmem:[%s5083_s1 + $0x20] sm:$0xff]  ;;  %v4159_v48 = vsel %vm808_vm8, %v787_v28, %v788_v42  ;;  %v954_v28 = vrot.slane %v216_v54, 1 }
  0x33   : > { %v3765_v50 = vpack.c.bf16 %v3427_v43, %v3426_v39 }
  0x35   : > { %3767 = vmatprep.subr.msk.bf16.mxu0 %vm3913_vm2, %v3765_v50 }
  0x36   : > { %1274 = vrot.lane.b32.xlu0 %v992_v4, %s3860_s5  ;;  %1276 = vrot.lane.b32.xlu1 %v1075_v8, %s3860_s5  ;;  %v373_v4 = vand.u32 15, %v247_v53  ;;  %v953_v8 = vrot.slane %v215_v56, 1 }
  0x37   : > { %3770 = vmatpush3.bf16.msk.msra.mxu0 %vm3913_vm2, %v3765_v50  ;;  %v401_v50 = vand.u32 15, %v251_v36 }
  0x38   : > { %vm4203_vm12 = vcmp.eq.s32.totalorder %v373_v4, 15  ;;  %v984_v43 = vsel %vm969_vm3, %v953_v8, %v954_v28 }
  0x39   : > { %vm699_vm14 = vcmp.eq.s32.totalorder %v401_v50, 15 }
  0x3a   : > { %1150 = vrot.lane.b32.xlu0 %v4025_v49, %s3859_s30  ;;  %1152 = vrot.lane.b32.xlu1 %v210_v63, %s3859_s30  ;;  %v4163_v49 = vsel %vm808_vm8, %v788_v42, %v789_v32  ;;  %v988_v63 = vsel %vm969_vm3, %v949_v14, %v950_v35  ;;  %v955_v32 = vrot.slane %v217_v21, 1  ;;  %v797_v42 = vrot.slane %v4236_v37, 7  ;;  %v4276_v14 = vld [vmem:[%s3932_s29 + $0xb8] sm:$0xff] }
  0x3c   : > { %v983_v35 = vsel %vm969_vm3, %v954_v28, %v955_v32  ;;  %v982_v57 = vsel %vm969_vm3, %v955_v32, %v956_v47  ;;  %v4294_v28 = vld [vmem:[%s3932_s29 + $0xc8] sm:$0xff] }
  0x3e   : > { %1278 = vrot.lane.b32.xlu0 %v990_v31, %s3860_s5  ;;  %1280 = vrot.lane.b32.xlu1 %v1077_v34, %s3860_s5  ;;  %v387_v31 = vand.u32 15, %v249_v19 }
  0x40   : > { %vm4228_vm13 = vcmp.eq.s32.totalorder %v387_v31, 15  ;;  %v4297_v31 = vld [vmem:[%s3932_s29 + $0xd0] sm:$0xff] }
  0x42   : > { %1154 = vrot.lane.b32.xlu0 %v4057_v0, %s3859_s30  ;;  %1156 = vrot.lane.b32.xlu1 %v212_v26, %s3859_s30  ;;  %v952_v0 = vrot.slane %v214_v44, 1 }
  0x44   : > { %v985_v17 = vsel %vm969_vm3, %v952_v0, %v953_v8  ;;  %v986_v25 = vsel %vm969_vm3, %v951_v38, %v952_v0  ;;  %v219_v38 = vld [vmem:[%s3932_s29 + $0xa0] sm:$0xff]  ;;  %v255_v8 = vadd.s32 184, %v3910_v5 }
  0x45   : > { %v1081_v26 = vsel %vm4203_vm12, 0.0, %v985_v17  ;;  %v796_v39 = vrot.slane %v219_v38, 7  ;;  %v957_v51 = vrot.slane %v219_v38, 1  ;;  %v4279_v17 = vld [vmem:[%s3932_s29 + $0xc0] sm:$0xff] }
  0x46   : > { %1282 = vrot.lane.b32.xlu0 %v988_v63, %s3860_s5  ;;  %1284 = vrot.lane.b32.xlu1 %v1079_v2, %s3860_s5  ;;  %v958_v63 = vrot.slane %v4236_v37, 1  ;;  %v415_v2 = vand.u32 15, %v253_v55 }
  0x47   : > { %v4248_v52 = vsel %vm808_vm8, %v795_v22, %v796_v39  ;;  %v4254_v53 = vsel %vm808_vm8, %v796_v39, %v797_v42 }
  0x48   : > { %vm701_vm15 = vcmp.eq.s32.totalorder %v415_v2, 15  ;;  %v980_v19 = vsel %vm969_vm3, %v957_v51, %v958_v63  ;;  %v4332_v2 = vld [vmem:[%s3932_s29 + $0xe8] sm:$0xff] }
  0x4a   : > { %1158 = vrot.lane.b32.xlu0 %v213_v29, %s3859_s30  ;;  %1160 = vrot.lane.b32.xlu1 %v214_v44, %s3859_s30  ;;  %v4224_v29 = vsel %vm808_vm8, %v794_v24, %v795_v22  ;;  %v1083_v44 = vsel %vm4228_vm13, 0.0, %v983_v35  ;;  %v429_v22 = vand.u32 15, %v255_v8  ;;  %v961_v24 = vrot.slane %v4279_v17, 1 }
  0x4b   : > { %v962_v35 = vrot.slane %v4294_v28, 1 }
  0x4c   : > { %vm703_vm1 = vcmp.eq.s32.totalorder %v429_v22, 15  ;;  %v268_v22 = vand.u32 15, %v3910_v5 }
  0x4d   : > { %v976_v50 = vsel %vm969_vm3, %v961_v24, %v962_v35 }
  0x4e   : > { %1286 = vrot.lane.b32.xlu0 %v986_v25, %s3860_s5  ;;  %1288 = vrot.lane.b32.xlu1 %v1081_v26, %s3860_s5  ;;  %v257_v26 = vadd.s32 200, %v3910_v5  ;;  %vm4360_vm7 = vcmp.eq.s32.totalorder %v268_v22, 0 }
  0x50   : > { %v443_v36 = vand.u32 15, %v257_v26 }
  0x52   : > { %1162 = vrot.lane.b32.xlu0 %v215_v56, %s3859_s30  ;;  %1164 = vrot.lane.b32.xlu1 %v216_v54, %s3859_s30  ;;  %v981_v54 = vsel %vm969_vm3, %v956_v47, %v957_v51  ;;  %v4262_v56 = vld [vmem:[%s3932_s29 + $0xb0] sm:$0xff]  ;;  %vm705_vm4 = vcmp.eq.s32.totalorder %v443_v36, 15  ;;  %v4316_v47 = vld [vmem:[%s3932_s29 + $0xe0] sm:$0xff]  ;;  %v234_v36 = vadd.s32 16, %v3910_v5 }
  0x53   : > { %v1085_v61 = vsel %vm699_vm14, 0.0, %v981_v54  ;;  %v959_v0 = vrot.slane %v4262_v56, 1 }
  0x55   : > { %v979_v4 = vsel %vm969_vm3, %v958_v63, %v959_v0  ;;  %v261_v63 = vadd.s32 232, %v3910_v5 }
  0x56   : > { %1290 = vrot.lane.b32.xlu0 %v984_v43, %s3860_s5  ;;  %1292 = vrot.lane.b32.xlu1 %v1083_v44, %s3860_s5  ;;  %v259_v43 = vadd.s32 216, %v3910_v5  ;;  %v4313_v44 = vld [vmem:[%s3932_s29 + $0xd8] sm:$0xff] }
  0x57   : > { %v964_v54 = vrot.slane %v4313_v44, 1 }
  0x58   : > { %v457_v55 = vand.u32 15, %v259_v43 }
  0x5a   : > { %1166 = vrot.lane.b32.xlu0 %v217_v21, %s3859_s30  ;;  %1168 = vrot.lane.b32.xlu1 %v218_v20, %s3859_s30  ;;  %v1087_v20 = vsel %vm701_vm15, 0.0, %v979_v4  ;;  %v960_v21 = vrot.slane %v4276_v14, 1  ;;  %vm707_vm5 = vcmp.eq.s32.totalorder %v457_v55, 15 }
  0x5c   : > { %v977_v25 = vsel %vm969_vm3, %v960_v21, %v961_v24  ;;  %v978_v32 = vsel %vm969_vm3, %v959_v0, %v960_v21  ;;  %v4335_v0 = vld [vmem:[%s3932_s29 + $0xf0] sm:$0xff]  ;;  %v807_v24 = vrot.slane %v4075_v9, 7 }
  0x5d   : > { %v1089_v34 = vsel %vm703_vm1, 0.0, %v977_v25  ;;  %v967_v21 = vrot.slane %v4335_v0, 1 }
  0x5e   : > { %1294 = vrot.lane.b32.xlu0 %v982_v57, %s3860_s5  ;;  %1296 = vrot.lane.b32.xlu1 %v1085_v61, %s3860_s5  ;;  %v965_v57 = vrot.slane %v4316_v47, 1 }
  0x60   : > { %v973_v61 = vsel %vm969_vm3, %v964_v54, %v965_v57 }
  0x61   : > { %v1093_v8 = vsel %vm707_vm5, 0.0, %v973_v61 }
  0x62   : > { %1170 = vrot.lane.b32.xlu0 %v219_v38, %s3859_s30  ;;  %1172 = vrot.lane.b32.xlu1 %v4236_v37, %s3859_s30  ;;  %v963_v38 = vrot.slane %v4297_v31, 1 }
  0x64   : > { %v975_v39 = vsel %vm969_vm3, %v962_v35, %v963_v38  ;;  %v974_v4 = vsel %vm969_vm3, %v963_v38, %v964_v54  ;;  %v840_v35 = vsel %vm808_vm8, %v807_v24, %v776_v58  ;;  %v282_v58 = vand.u32 15, %v234_v36 }
  0x65   : > { %v1091_v51 = vsel %vm705_vm4, 0.0, %v975_v39  ;;  %v905_v13 = vsel %vm4360_vm7, 0.0, %v840_v35 }
  0x66   : > { %1298 = vrot.lane.b32.xlu0 %v980_v19, %s3860_s5  ;;  %1300 = vrot.lane.b32.xlu1 %v1087_v20, %s3860_s5  ;;  %v966_v19 = vrot.slane %v4332_v2, 1  ;;  %v471_v20 = vand.u32 15, %v261_v63  ;;  %vm4389_vm13 = vcmp.eq.s32.totalorder %v282_v58, 0 }
  0x68   : > { %vm4349_vm6 = vcmp.eq.s32.totalorder %v471_v20, 15  ;;  %v971_v26 = vsel %vm969_vm3, %v966_v19, %v967_v21  ;;  %v972_v38 = vsel %vm969_vm3, %v965_v57, %v966_v19  ;;  %v970_v19 = vsel %vm969_vm3, %v967_v21, %v968_v15 }
  0x69   : > { %v1095_v39 = vsel %vm4349_vm6, 0.0, %v971_v26 }
  0x6a   : > { %1174 = vrot.lane.b32.xlu0 %v4262_v56, %s3859_s30  ;;  %1176 = vrot.lane.b32.xlu1 %v4276_v14, %s3859_s30 }
  0x6e   : > { %1302 = vrot.lane.b32.xlu0 %v978_v32, %s3860_s5  ;;  %1304 = vrot.lane.b32.xlu1 %v1089_v34, %s3860_s5  ;;  %v263_v32 = vadd.s32 248, %v3910_v5 }
  0x72   : > { %1178 = vrot.lane.b32.xlu0 %v4279_v17, %s3859_s30  ;;  %1180 = vrot.lane.b32.xlu1 %v4294_v28, %s3859_s30 }
  0x76   : > { %1306 = vrot.lane.b32.xlu0 %v976_v50, %s3860_s5  ;;  %1308 = vrot.lane.b32.xlu1 %v1091_v51, %s3860_s5  ;;  %v485_v51 = vand.u32 15, %v263_v32  ;;  %v907_v32 = vsel %vm4389_vm13, 0.0, %v4079_v10 }
  0x78   : > { %vm4380_vm12 = vcmp.eq.s32.totalorder %v485_v51, 15 }
  0x79   : > { %v1097_v20 = vsel %vm4380_vm12, 0.0, %v4096_v23 }
  0x7a   : > { %1182 = vrot.lane.b32.xlu0 %v4297_v31, %s3859_s30  ;;  %1184 = vrot.lane.b32.xlu1 %v4313_v44, %s3859_s30 }
  0x7e   : > { %1310 = vrot.lane.b32.xlu0 %v974_v4, %s3860_s5  ;;  %1312 = vrot.lane.b32.xlu1 %v1093_v8, %s3860_s5  ;;  %v236_v8 = vadd.s32 32, %v3910_v5 }
  0x80   : > { %v296_v15 = vand.u32 15, %v236_v8 }
  0x82   : > { %1186 = vrot.lane.b32.xlu0 %v4316_v47, %s3859_s30  ;;  %1188 = vrot.lane.b32.xlu1 %v4332_v2, %s3859_s30  ;;  %vm4429_vm14 = vcmp.eq.s32.totalorder %v296_v15, 0 }
  0x84   : > { %v1137_v43 = vpop.permute.xlu1 %1136  ;;  %v1131_v50 = vpop.permute.xlu0 %1130 }
  0x85   : > { %v1355_v54 = vsel %vm1354_vm9, %v905_v13, %v1131_v50 }
  0x86   : > { %1314 = vrot.lane.b32.xlu0 %v972_v38, %s3860_s5  ;;  %1316 = vrot.lane.b32.xlu1 %v1095_v39, %s3860_s5  ;;  %v238_v39 = vadd.s32 48, %v3910_v5 }
  0x88   : > { %v1133_v55 = vpop.permute.xlu0 %1132  ;;  %v1259_v57 = vpop.permute.xlu1 %1258  ;;  %v310_v50 = vand.u32 15, %v238_v39 }
  0x89   : > { %v1388_v63 = vsel %vm1387_vm10, %v1355_v54, %v1259_v57  ;;  %v1356_v22 = vsel %vm1354_vm9, %v4063_v1, %v1133_v55  ;;  %v1358_v1 = vsel %vm1354_vm9, %v4053_v62, %v1137_v43  ;;  %v909_v43 = vsel %vm4429_vm14, 0.0, %v4100_v18 }
  0x8a   : > { %1190 = vrot.lane.b32.xlu0 %v4335_v0, %s3859_s30  ;;  %1192 = vrot.lane.b32.xlu1 %v4075_v9, %s3859_s30  ;;  %v240_v18 = vadd.s32 64, %v3910_v5 }
  0x8b   : > { %3587 = vmatprep.mubr.msk.f32.mxu1 %vm1617_vm11, %v1388_v63  ;;  %3642 = vmatprep.mubr.msk.f32.mxu0 %vm1617_vm11, %v1388_v63 }
  0x8c   : > { %v1135_v25 = vpop.permute.xlu0 %1134  ;;  %v1261_v26 = vpop.permute.xlu1 %1260  ;;  %v324_v4 = vand.u32 15, %v240_v18 }
  0x8d   : > { %v1389_v35 = vsel %vm1387_vm10, %v1356_v22, %v1261_v26  ;;  %v1357_v23 = vsel %vm1354_vm9, %v907_v32, %v1135_v25 }
  0x8e   : > { %1318 = vrot.lane.b32.xlu0 %v970_v19, %s3860_s5  ;;  %1320 = vrot.lane.b32.xlu1 %v1097_v20, %s3860_s5  ;;  %vm4473_vm15 = vcmp.eq.s32.totalorder %v324_v4, 0 }
  0x8f   : > { %3588 = vmatmul.mubr.msk.f32.vlgmr.msra.gmra.mrb[0].mxu1 %vm1617_vm11, %v1389_v35  ;;  %3643 = vmatmul.mubr.msk.f32.gmra.mrb[2].mxu0 %vm1617_vm11, %v1389_v35  ;;  %v913_v15 = vsel %vm4473_vm15, 0.0, %v4133_v40  ;;  %v244_v40 = vadd.s32 96, %v3910_v5 }
  0x90   : > { %v1263_v21 = vpop.permute.xlu0 %1262  ;;  %v1265_v36 = vpop.permute.xlu1 %1264  ;;  %3772 = vmatpush3.bf16.msk.msra.mxu1 %vm3913_vm2, %v3903_v3  ;;  %vm654_vm2 = vcmp.eq.s32.totalorder %v310_v50, 0 }
  0x91   : > { %v4420_v10 = vsel %vm1387_vm10, %v1357_v23, %v1263_v21  ;;  %v4423_v38 = vsel %vm1387_vm10, %v1358_v1, %v1265_v36  ;;  %v911_v63 = vsel %vm654_vm2, 0.0, %v4115_v16 }
  0x92   : > { %3590 = vmatprep.mubr.msk.f32.mxu1 %vm1617_vm11, %v4420_v10  ;;  %3645 = vmatprep.mubr.msk.f32.mxu0 %vm1617_vm11, %v4420_v10 }
  0x93   : > { %3591 = vmatmul.mubr.msk.f32.gmra.mrb[2].mxu1 %vm1617_vm11, %v4423_v38  ;;  %3646 = vmatmul.mubr.msk.f32.gmra.mrb[4].mxu0 %vm1617_vm11, %v4423_v38 }
  0x94   : > { %v1139_v3 = vpop.permute.xlu0 %1138  ;;  %v1141_v6 = vpop.permute.xlu1 %1140 }
  0x95   : > { %v1359_v51 = vsel %vm1354_vm9, %v909_v43, %v1139_v3  ;;  %v1360_v13 = vsel %vm1354_vm9, %v4111_v27, %v1141_v6 }
  0x98   : > { %v1267_v58 = vpop.permute.xlu0 %1266  ;;  %v1269_v54 = vpop.permute.xlu1 %1268 }
  0x99   : > { %v4445_v55 = vsel %vm1387_vm10, %v1359_v51, %v1267_v58  ;;  %v4448_v57 = vsel %vm1387_vm10, %v1360_v13, %v1269_v54  ;;  %v352_v51 = vand.u32 15, %v244_v40 }
  0x9a   : > { %3593 = vmatprep.mubr.msk.f32.mxu1 %vm1617_vm11, %v4445_v55  ;;  %3648 = vmatprep.mubr.msk.f32.mxu0 %vm1617_vm11, %v4445_v55 }
  0x9b   : > { %3594 = vmatmul.mubr.msk.f32.gmra.mrb[4].mxu1 %vm1617_vm11, %v4448_v57  ;;  %3649 = vmatmul.mubr.msk.f32.gmra.mrb[6].mxu0 %vm1617_vm11, %v4448_v57  ;;  %vm4517_vm4 = vcmp.eq.s32.totalorder %v352_v51, 0 }
  0x9c   : > { %v1143_v27 = vpop.permute.xlu0 %1142  ;;  %v1145_v61 = vpop.permute.xlu1 %1144 }
  0x9d   : > { %v1361_v8 = vsel %vm1354_vm9, %v911_v63, %v1143_v27  ;;  %v1362_v19 = vsel %vm1354_vm9, %v4120_v30, %v1145_v61  ;;  %v242_v30 = vadd.s32 80, %v3910_v5 }
  0x9f   : > { %v338_v1 = vand.u32 15, %v242_v30 }
  0xa0   : > { %v1271_v20 = vpop.permute.xlu0 %1270  ;;  %v1273_v22 = vpop.permute.xlu1 %1272 }
  0xa1   : > { %v4464_v25 = vsel %vm1387_vm10, %v1361_v8, %v1271_v20  ;;  %v4467_v26 = vsel %vm1387_vm10, %v1362_v19, %v1273_v22  ;;  %vm658_vm1 = vcmp.eq.s32.totalorder %v338_v1, 0  ;;  %v917_v8 = vsel %vm4517_vm4, 0.0, %v4159_v48 }
  0xa2   : > { %3596 = vmatprep.mubr.msk.f32.mxu1 %vm1617_vm11, %v4464_v25  ;;  %3651 = vmatprep.mubr.msk.f32.mxu0 %vm1617_vm11, %v4464_v25  ;;  %v915_v50 = vsel %vm658_vm1, 0.0, %v4149_v45  ;;  %v248_v48 = vadd.s32 128, %v3910_v5 }
  0xa3   : > { %3597 = vmatmul.mubr.msk.f32.gmra.mrb[6].mxu1 %vm1617_vm11, %v4467_v26  ;;  %3652 = vmatmul.mubr.msk.f32.gmra.mrb[8].mxu0 %vm1617_vm11, %v4467_v26 }
  0xa4   : > { %v1147_v32 = vpop.permute.xlu0 %1146  ;;  %v1149_v35 = vpop.permute.xlu1 %1148 }
  0xa5   : > { %v1363_v23 = vsel %vm1354_vm9, %v913_v15, %v1147_v32  ;;  %v1364_v21 = vsel %vm1354_vm9, %v4137_v41, %v1149_v35 }
  0xa8   : > { %v1275_v36 = vpop.permute.xlu0 %1274  ;;  %v1277_v39 = vpop.permute.xlu1 %1276 }
  0xa9   : > { %v4489_v3 = vsel %vm1387_vm10, %v1363_v23, %v1275_v36  ;;  %v4492_v6 = vsel %vm1387_vm10, %v1364_v21, %v1277_v39  ;;  %v380_v21 = vand.u32 15, %v248_v48 }
  0xaa   : > { %3599 = vmatprep.mubr.msk.f32.mxu1 %vm1617_vm11, %v4489_v3  ;;  %3654 = vmatprep.mubr.msk.f32.mxu0 %vm1617_vm11, %v4489_v3 }
  0xab   : > { %3600 = vmatmul.mubr.msk.f32.gmra.mrb[8].mxu1 %vm1617_vm11, %v4492_v6  ;;  %3655 = vmatmul.mubr.msk.f32.gmra.mrb[10].mxu0 %vm1617_vm11, %v4492_v6  ;;  %vm4561_vm6 = vcmp.eq.s32.totalorder %v380_v21, 0 }
  0xac   : > { %v1151_v41 = vpop.permute.xlu0 %1150  ;;  %v1153_v43 = vpop.permute.xlu1 %1152 }
  0xad   : > { %v1365_v13 = vsel %vm1354_vm9, %v915_v50, %v1151_v41  ;;  %v1366_v58 = vsel %vm1354_vm9, %v4153_v46, %v1153_v43  ;;  %v246_v46 = vadd.s32 112, %v3910_v5 }
  0xaf   : > { %v366_v19 = vand.u32 15, %v246_v46 }
  0xb0   : > { %v1279_v54 = vpop.permute.xlu0 %1278  ;;  %v1281_v18 = vpop.permute.xlu1 %1280 }
  0xb1   : > { %v4508_v27 = vsel %vm1387_vm10, %v1365_v13, %v1279_v54  ;;  %v4511_v61 = vsel %vm1387_vm10, %v1366_v58, %v1281_v18  ;;  %vm662_vm5 = vcmp.eq.s32.totalorder %v366_v19, 0  ;;  %v921_v58 = vsel %vm4561_vm6, 0.0, %v4195_v11 }
  0xb2   : > { %3602 = vmatprep.mubr.msk.f32.mxu1 %vm1617_vm11, %v4508_v27  ;;  %3657 = vmatprep.mubr.msk.f32.mxu0 %vm1617_vm11, %v4508_v27  ;;  %v919_v23 = vsel %vm662_vm5, 0.0, %v4181_v59  ;;  %v252_v11 = vadd.s32 160, %v3910_v5 }
  0xb3   : > { %3603 = vmatmul.mubr.msk.f32.gmra.mrb[10].mxu1 %vm1617_vm11, %v4511_v61  ;;  %3658 = vmatmul.mubr.msk.f32.gmra.mrb[12].mxu0 %vm1617_vm11, %v4511_v61 }
  0xb4   : > { %v1155_v63 = vpop.permute.xlu0 %1154  ;;  %v1157_v4 = vpop.permute.xlu1 %1156 }
  0xb5   : > { %v1367_v20 = vsel %vm1354_vm9, %v917_v8, %v1155_v63  ;;  %v1368_v22 = vsel %vm1354_vm9, %v4163_v49, %v1157_v4 }
  0xb8   : > { %v1283_v30 = vpop.permute.xlu0 %1282  ;;  %v1285_v32 = vpop.permute.xlu1 %1284 }
  0xb9   : > { %v4533_v35 = vsel %vm1387_vm10, %v1367_v20, %v1283_v30  ;;  %v4536_v15 = vsel %vm1387_vm10, %v1368_v22, %v1285_v32  ;;  %v408_v30 = vand.u32 15, %v252_v11 }
  0xba   : > { %3605 = vmatprep.mubr.msk.f32.mxu1 %vm1617_vm11, %v4533_v35  ;;  %3660 = vmatprep.mubr.msk.f32.mxu0 %vm1617_vm11, %v4533_v35 }
  0xbb   : > { %3606 = vmatmul.mubr.msk.f32.gmra.mrb[12].mxu1 %vm1617_vm11, %v4536_v15  ;;  %3661 = vmatmul.mubr.msk.f32.gmra.mrb[14].mxu0 %vm1617_vm11, %v4536_v15  ;;  %vm4609_vm13 = vcmp.eq.s32.totalorder %v408_v30, 0 }
  0xbc   : > { %v1159_v49 = vpop.permute.xlu0 %1158  ;;  %v1161_v1 = vpop.permute.xlu1 %1160  ;;  %v925_v21 = vsel %vm4609_vm13, 0.0, %v4248_v52 }
  0xbd   : > { %v1369_v36 = vsel %vm1354_vm9, %v919_v23, %v1159_v49  ;;  %v1370_v39 = vsel %vm1354_vm9, %v4185_v60, %v1161_v1  ;;  %v250_v60 = vadd.s32 144, %v3910_v5 }
  0xbf   : > { %v394_v54 = vand.u32 15, %v250_v60 }
  0xc0   : > { %v1287_v40 = vpop.permute.xlu0 %1286  ;;  %v1289_v41 = vpop.permute.xlu1 %1288 }
  0xc1   : > { %v4552_v43 = vsel %vm1387_vm10, %v1369_v36, %v1287_v40  ;;  %v4555_v50 = vsel %vm1387_vm10, %v1370_v39, %v1289_v41  ;;  %vm666_vm12 = vcmp.eq.s32.totalorder %v394_v54, 0  ;;  %v798_v39 = vrot.slane %v4262_v56, 7 }
  0xc2   : > { %3608 = vmatprep.mubr.msk.f32.mxu1 %vm1617_vm11, %v4552_v43  ;;  %3663 = vmatprep.mubr.msk.f32.mxu0 %vm1617_vm11, %v4552_v43  ;;  %v923_v22 = vsel %vm666_vm12, 0.0, %v4220_v33 }
  0xc3   : > { %3609 = vmatmul.mubr.msk.f32.gmra.mrb[14].mxu1 %vm1617_vm11, %v4555_v50  ;;  %3664 = vmatmul.mubr.msk.f32.gmra.mrb[16].mxu0 %vm1617_vm11, %v4555_v50 }
  0xc4   : > { %v1163_v51 = vpop.permute.xlu0 %1162  ;;  %v1165_v13 = vpop.permute.xlu1 %1164 }
  0xc5   : > { %v1371_v18 = vsel %vm1354_vm9, %v921_v58, %v1163_v51  ;;  %v1372_v46 = vsel %vm1354_vm9, %v4199_v12, %v1165_v13 }
  0xc8   : > { %v1291_v63 = vpop.permute.xlu0 %1290  ;;  %v1293_v4 = vpop.permute.xlu1 %1292 }
  0xc9   : > { %v4577_v8 = vsel %vm1387_vm10, %v1371_v18, %v1291_v63  ;;  %v4580_v19 = vsel %vm1387_vm10, %v1372_v46, %v1293_v4 }
  0xca   : > { %3611 = vmatprep.mubr.msk.f32.mxu1 %vm1617_vm11, %v4577_v8  ;;  %3666 = vmatprep.mubr.msk.f32.mxu0 %vm1617_vm11, %v4577_v8 }
  0xcb   : > { %3612 = vmatmul.mubr.msk.f32.gmra.mrb[16].mxu1 %vm1617_vm11, %v4580_v19  ;;  %3667 = vmatmul.mubr.msk.f32.gmra.mrb[18].mxu0 %vm1617_vm11, %v4580_v19 }
  0xcc   : > { %v1167_v12 = vpop.permute.xlu0 %1166  ;;  %v1169_v20 = vpop.permute.xlu1 %1168  ;;  %3691 = vmatprep.mubr.msk.f32.mxu0 %vm1617_vm11, %v4420_v10 }
  0xcd   : > { %v1373_v32 = vsel %vm1354_vm9, %v923_v22, %v1167_v12  ;;  %v1374_v48 = vsel %vm1354_vm9, %v4224_v29, %v1169_v20  ;;  %v254_v29 = vadd.s32 176, %v3910_v5  ;;  %v802_v22 = vrot.slane %v4297_v31, 7 }
  0xcf   : > { %3692 = vmatmul.mubr.msk.f32.vlgmr.msra.gmra.mrb[0].mxu0 %vm1617_vm11, %v4423_v38  ;;  %v422_v36 = vand.u32 15, %v254_v29 }
  0xd0   : > { %v1295_v49 = vpop.permute.xlu0 %1294  ;;  %v1297_v1 = vpop.permute.xlu1 %1296  ;;  %3694 = vmatprep.mubr.msk.f32.mxu0 %vm1617_vm11, %v4445_v55 }
  0xd1   : > { %v4602_v23 = vsel %vm1387_vm10, %v1373_v32, %v1295_v49  ;;  %v4605_v10 = vsel %vm1387_vm10, %v1374_v48, %v1297_v1  ;;  %vm670_vm2 = vcmp.eq.s32.totalorder %v422_v36, 0 }
  0xd2   : > { %3614 = vmatprep.mubr.msk.f32.mxu1 %vm1617_vm11, %v4602_v23 }
  0xd3   : > { %3615 = vmatmul.mubr.msk.f32.gmra.mrb[18].mxu1 %vm1617_vm11, %v4605_v10  ;;  %3695 = vmatmul.mubr.msk.f32.gmra.mrb[2].mxu0 %vm1617_vm11, %v4448_v57 }
  0xd4   : > { %v1171_v38 = vpop.permute.xlu0 %1170  ;;  %v1173_v55 = vpop.permute.xlu1 %1172  ;;  %3697 = vmatprep.mubr.msk.f32.mxu0 %vm1617_vm11, %v4464_v25  ;;  %v799_v25 = vrot.slane %v4276_v14, 7 }
  0xd5   : > { %v1375_v40 = vsel %vm1354_vm9, %v925_v21, %v1171_v38  ;;  %v1376_v57 = vsel %vm1354_vm9, %v4254_v53, %v1173_v55  ;;  %v818_v53 = vsel %vm808_vm8, %v797_v42, %v798_v39  ;;  %v800_v42 = vrot.slane %v4279_v17, 7 }
  0xd6   : > { %v927_v51 = vsel %vm670_vm2, 0.0, %v818_v53  ;;  %v817_v37 = vsel %vm808_vm8, %v798_v39, %v799_v25  ;;  %v804_v21 = vrot.slane %v4316_v47, 7  ;;  %v262_v53 = vadd.s32 240, %v3910_v5 }
  0xd7   : > { %3698 = vmatmul.mubr.msk.f32.gmra.mrb[4].mxu0 %vm1617_vm11, %v4467_v26  ;;  %v256_v26 = vadd.s32 192, %v3910_v5 }
  0xd8   : > { %v1299_v41 = vpop.permute.xlu0 %1298  ;;  %v1301_v60 = vpop.permute.xlu1 %1300  ;;  %3700 = vmatprep.mubr.msk.f32.mxu0 %vm1617_vm11, %v4489_v3 }
  0xd9   : > { %v4633_v52 = vsel %vm1387_vm10, %v1375_v40, %v1299_v41  ;;  %v4636_v56 = vsel %vm1387_vm10, %v1376_v57, %v1301_v60  ;;  %v436_v13 = vand.u32 15, %v256_v26  ;;  %v805_v57 = vrot.slane %v4332_v2, 7 }
  0xda   : > { %3617 = vmatprep.mubr.msk.f32.mxu1 %vm1617_vm11, %v4633_v52 }
  0xdb   : > { %3618 = vmatmul.mubr.msk.f32.gmra.mrb[20].mxu1 %vm1617_vm11, %v4636_v56  ;;  %3701 = vmatmul.mubr.msk.f32.gmra.mrb[6].mxu0 %vm1617_vm11, %v4492_v6  ;;  %vm4669_vm1 = vcmp.eq.s32.totalorder %v436_v13, 0 }
  0xdc   : > { %v1175_v14 = vpop.permute.xlu0 %1174  ;;  %v1177_v3 = vpop.permute.xlu1 %1176  ;;  %3703 = vmatprep.mubr.msk.f32.mxu0 %vm1617_vm11, %v4508_v27  ;;  %v801_v27 = vrot.slane %v4294_v28, 7 }
  0xdd   : > { %v1377_v58 = vsel %vm1354_vm9, %v927_v51, %v1175_v14  ;;  %v1378_v54 = vsel %vm1354_vm9, %v817_v37, %v1177_v3  ;;  %v811_v3 = vsel %vm808_vm8, %v804_v21, %v805_v57  ;;  %v478_v51 = vand.u32 15, %v262_v53 }
  0xde   : > { %v815_v12 = vsel %vm808_vm8, %v800_v42, %v801_v27  ;;  %v814_v31 = vsel %vm808_vm8, %v801_v27, %v802_v22  ;;  %v806_v37 = vrot.slane %v4335_v0, 7 }
  0xdf   : > { %3704 = vmatmul.mubr.msk.f32.gmra.mrb[8].mxu0 %vm1617_vm11, %v4511_v61  ;;  %v816_v61 = vsel %vm808_vm8, %v799_v25, %v800_v42  ;;  %vm678_vm2 = vcmp.eq.s32.totalorder %v478_v51, 0 }
  0xe0   : > { %v1303_v6 = vpop.permute.xlu0 %1302  ;;  %v1305_v18 = vpop.permute.xlu1 %1304  ;;  %3706 = vmatprep.mubr.msk.f32.mxu0 %vm1617_vm11, %v4533_v35  ;;  %v258_v35 = vadd.s32 208, %v3910_v5  ;;  %v929_v11 = vsel %vm4669_vm1, 0.0, %v816_v61  ;;  %v810_v0 = vsel %vm808_vm8, %v805_v57, %v806_v37 }
  0xe1   : > { %v4662_v46 = vsel %vm1387_vm10, %v1377_v58, %v1303_v6  ;;  %v4665_v63 = vsel %vm1387_vm10, %v1378_v54, %v1305_v18 }
  0xe2   : > { %3620 = vmatprep.mubr.msk.f32.mxu1 %vm1617_vm11, %v4662_v46  ;;  %v450_v20 = vand.u32 15, %v258_v35  ;;  %v935_v35 = vsel %vm678_vm2, 0.0, %v810_v0 }
  0xe3   : > { %3621 = vmatmul.mubr.msk.f32.gmra.mrb[22].mxu1 %vm1617_vm11, %v4665_v63  ;;  %3707 = vmatmul.mubr.msk.f32.gmra.mrb[10].mxu0 %vm1617_vm11, %v4536_v15 }
  0xe4   : > { %v1179_v28 = vpop.permute.xlu0 %1178  ;;  %v1181_v4 = vpop.permute.xlu1 %1180  ;;  %3709 = vmatprep.mubr.msk.f32.mxu0 %vm1617_vm11, %v4552_v43  ;;  %v803_v43 = vrot.slane %v4313_v44, 7  ;;  %vm674_vm5 = vcmp.eq.s32.totalorder %v450_v20, 0 }
  0xe5   : > { %v1379_v30 = vsel %vm1354_vm9, %v929_v11, %v1179_v28  ;;  %v1380_v15 = vsel %vm1354_vm9, %v815_v12, %v1181_v4  ;;  %v931_v29 = vsel %vm674_vm5, 0.0, %v814_v31  ;;  %v809_v28 = vsel %vm808_vm8, %v806_v37, %v807_v24 }
  0xe6   : > { %v813_v38 = vsel %vm808_vm8, %v802_v22, %v803_v43  ;;  %v812_v25 = vsel %vm808_vm8, %v803_v43, %v804_v21 }
  0xe7   : > { %3710 = vmatmul.mubr.msk.f32.gmra.mrb[12].mxu0 %vm1617_vm11, %v4555_v50  ;;  %v260_v50 = vadd.s32 224, %v3910_v5 }
  0xe8   : > { %v1307_v32 = vpop.permute.xlu0 %1306  ;;  %v1309_v48 = vpop.permute.xlu1 %1308  ;;  %3712 = vmatprep.mubr.msk.f32.mxu0 %vm1617_vm11, %v4577_v8 }
  0xe9   : > { %v4695_v49 = vsel %vm1387_vm10, %v1379_v30, %v1307_v32  ;;  %v4698_v1 = vsel %vm1387_vm10, %v1380_v15, %v1309_v48  ;;  %v464_v55 = vand.u32 15, %v260_v50 }
  0xea   : > { %3623 = vmatprep.mubr.msk.f32.mxu1 %vm1617_vm11, %v4695_v49 }
  0xeb   : > { %3624 = vmatmul.mubr.msk.f32.gmra.mrb[24].mxu1 %vm1617_vm11, %v4698_v1  ;;  %3713 = vmatmul.mubr.msk.f32.gmra.mrb[14].mxu0 %vm1617_vm11, %v4580_v19  ;;  %vm4724_vm12 = vcmp.eq.s32.totalorder %v464_v55, 0 }
  0xec   : > { %v1183_v44 = vpop.permute.xlu0 %1182  ;;  %v1185_v8 = vpop.permute.xlu1 %1184  ;;  %3715 = vmatprep.mubr.msk.f32.mxu0 %vm1617_vm11, %v4602_v23  ;;  %v933_v14 = vsel %vm4724_vm12, 0.0, %v812_v25 }
  0xed   : > { %v1381_v36 = vsel %vm1354_vm9, %v931_v29, %v1183_v44  ;;  %v1382_v39 = vsel %vm1354_vm9, %v813_v38, %v1185_v8  ;;  %v3155_v8 = vld [vmem:[%s5085_s3] sm:$0xf]  ;;  %v4818_v38 = vstv %s2626_s10 }
  0xee   : > { %3739 = vmatprep.subr.msk.mxu1 %vm1714_vm0, %v3155_v8 }
  0xef   : > { %3716 = vmatmul.mubr.msk.f32.gmra.mrb[16].mxu0 %vm1617_vm11, %v4605_v10 }
  0xf0   : > { %v1311_v19 = vpop.permute.xlu0 %1310  ;;  %v1313_v40 = vpop.permute.xlu1 %1312  ;;  %3718 = vmatprep.mubr.msk.f32.mxu0 %vm1617_vm11, %v4633_v52 }
  0xf1   : > { %v1414_v41 = vsel %vm1387_vm10, %v1381_v36, %v1311_v19  ;;  %v1415_v60 = vsel %vm1387_vm10, %v1382_v39, %v1313_v40 }
  0xf2   : > { %3626 = vmatprep.mubr.msk.f32.mxu1 %vm1617_vm11, %v1414_v41 }
  0xf3   : > { %3627 = vmatmul.mubr.msk.f32.gmra.mrb[26].mxu1 %vm1617_vm11, %v1415_v60  ;;  %3719 = vmatmul.mubr.msk.f32.gmra.mrb[18].mxu0 %vm1617_vm11, %v4636_v56 }
  0xf4   : > { %v1187_v2 = vpop.permute.xlu0 %1186  ;;  %v1189_v26 = vpop.permute.xlu1 %1188  ;;  %3721 = vmatprep.mubr.msk.f32.mxu0 %vm1617_vm11, %v4662_v46 }
  0xf5   : > { %v1383_v13 = vsel %vm1354_vm9, %v933_v14, %v1187_v2  ;;  %v1384_v42 = vsel %vm1354_vm9, %v811_v3, %v1189_v26 }
  0xf7   : > { %3722 = vmatmul.mubr.msk.f32.gmra.mrb[20].mxu0 %vm1617_vm11, %v4665_v63 }
  0xf8   : > { %v1315_v58 = vpop.permute.xlu0 %1314  ;;  %v1317_v54 = vpop.permute.xlu1 %1316  ;;  %3724 = vmatprep.mubr.msk.f32.mxu0 %vm1617_vm11, %v4695_v49 }
  0xf9   : > { %v1416_v6 = vsel %vm1387_vm10, %v1383_v13, %v1315_v58  ;;  %v1417_v18 = vsel %vm1387_vm10, %v1384_v42, %v1317_v54 }
  0xfa   : > { %3629 = vmatprep.mubr.msk.f32.mxu1 %vm1617_vm11, %v1416_v6 }
  0xfb   : > { %3630 = vmatmul.mubr.msk.f32.gmra.mrb[28].mxu1 %vm1617_vm11, %v1417_v18  ;;  %3725 = vmatmul.mubr.msk.f32.gmra.mrb[22].mxu0 %vm1617_vm11, %v4698_v1 }
  0xfc   : > { %v1191_v27 = vpop.permute.xlu0 %1190  ;;  %v1193_v61 = vpop.permute.xlu1 %1192  ;;  %3727 = vmatprep.mubr.msk.f32.mxu0 %vm1617_vm11, %v1414_v41 }
  0xfd   : > { %v1385_v4 = vsel %vm1354_vm9, %v935_v35, %v1191_v27  ;;  %v1386_v11 = vsel %vm1354_vm9, %v809_v28, %v1193_v61 }
  0xff   : > { %3728 = vmatmul.mubr.msk.f32.gmra.mrb[24].mxu0 %vm1617_vm11, %v1415_v60 }
 0x100   : > { %v1319_v12 = vpop.permute.xlu0 %1318  ;;  %v1321_v20 = vpop.permute.xlu1 %1320  ;;  %3730 = vmatprep.mubr.msk.f32.mxu0 %vm1617_vm11, %v1416_v6 }
 0x101   : > { %v1418_v22 = vsel %vm1387_vm10, %v1385_v4, %v1319_v12  ;;  %v1419_v30 = vsel %vm1387_vm10, %v1386_v11, %v1321_v20 }
 0x102   : > { %3632 = vmatprep.mubr.msk.f32.mxu1 %vm1617_vm11, %v1418_v22 }
 0x103   : > { %3633 = vmatmul.mubr.msk.f32.gmra.mrb[30].mxu1 %vm1617_vm11, %v1419_v30  ;;  %3731 = vmatmul.mubr.msk.f32.gmra.mrb[26].mxu0 %vm1617_vm11, %v1417_v18 }
 0x104   : > { %3669 = vmatprep.mubr.msk.f32.mxu1 %vm1617_vm11, %v4602_v23  ;;  %3733 = vmatprep.mubr.msk.f32.mxu0 %vm1617_vm11, %v1418_v22 }
 0x107   : > { %3670 = vmatmul.mubr.msk.f32.vlgmr.msra.gmra.mrb[20].mxu1 %vm1617_vm11, %v4605_v10  ;;  %3734 = vmatmul.mubr.msk.f32.gmra.mrb[28].mxu0 %vm1617_vm11, %v1419_v30 }
 0x108   : > { %3672 = vmatprep.mubr.msk.f32.mxu1 %vm1617_vm11, %v4633_v52  ;;  %3736 = vmatprep.mubr.f32.mxu0 %v3858_v7 }
 0x109   : > { %3740 = vmatpush3.msk.msra.mxu1 %vm1714_vm0, %v3155_v8 }
 0x10b   : > { %3673 = vmatmul.mubr.msk.f32.gmra.mrb[22].mxu1 %vm1617_vm11, %v4636_v56  ;;  %3737 = vmatmul.mubr.f32.gmra.mrb[30].mxu0 %v3858_v7 }
 0x10c   : > { %3675 = vmatprep.mubr.msk.f32.mxu1 %vm1617_vm11, %v4662_v46 }
 0x10f   : > { %3676 = vmatmul.mubr.msk.f32.gmra.mrb[24].mxu1 %vm1617_vm11, %v4665_v63 }
 0x110   : > { %3678 = vmatprep.mubr.msk.f32.mxu1 %vm1617_vm11, %v4695_v49 }
 0x113   : > { %3679 = vmatmul.mubr.msk.f32.gmra.mrb[26].mxu1 %vm1617_vm11, %v4698_v1 }
 0x114   : > { %3681 = vmatprep.mubr.msk.f32.mxu1 %vm1617_vm11, %v1414_v41 }
 0x117   : > { %3682 = vmatmul.mubr.msk.f32.gmra.mrb[28].mxu1 %vm1617_vm11, %v1415_v60 }
 0x118   : > { %3684 = vmatprep.mubr.msk.f32.mxu1 %vm1617_vm11, %v1416_v6 }
 0x11b   : > { %3685 = vmatmul.mubr.msk.f32.gmra.mrb[30].mxu1 %vm1617_vm11, %v1417_v18 }
 0x162   : > { %v3589_v7 = vpop.f32.mrb[0].mxu1 }
 0x163   : > { %v1784_v9 = vpop.f32.mrb[1].mxu1 }
 0x166   : > { %v3592_v24 = vpop.f32.mrb[2].mxu1 }
 0x167   : > { %v1794_v23 = vpop.f32.mrb[3].mxu1 }
 0x16e   : > { %v3595_v10 = vpop.f32.mrb[4].mxu1 }
 0x16f   : > { %v1804_v52 = vpop.f32.mrb[5].mxu1 }
 0x176   : > { %v3598_v56 = vpop.f32.mrb[6].mxu1 }
 0x177   : > { %v4793_v46 = vpop.f32.mrb[7].mxu1 }
 0x17e   : > { %v4795_v63 = vpop.f32.mrb[8].mxu1 }
 0x17f   : > { %v4797_v15 = vpop.f32.mrb[9].mxu1 }
 0x186   : > { %v4799_v32 = vpop.f32.mrb[10].mxu1 }
 0x187   : > { %v4801_v48 = vpop.f32.mrb[11].mxu1 }
 0x18e   : > { %v4803_v43 = vpop.f32.mrb[12].mxu1 }
 0x18f   : > { %v4805_v49 = vpop.f32.mrb[13].mxu1 }
 0x196   : > { %v4807_v1 = vpop.f32.mrb[14].mxu1 }
 0x197   : > { %v4809_v31 = vpop.f32.mrb[15].mxu1 }
 0x19e   : > { %v4811_v50 = vpop.f32.mrb[16].mxu1 }
 0x19f   : > { %v4813_v44 = vpop.f32.mrb[17].mxu1 }
 0x1a2   : > { %v3693_v29 = vpop.f32.mrb[0].mxu0 }
 0x1a3   : > { %v3773_v55 = vadd.f32 %v3693_v29, %v3589_v7  ;;  %v2435_v21 = vpop.f32.mrb[1].mxu0 }
 0x1a4   : > { %v3774_v36 = vadd.f32 %v2435_v21, %v1784_v9 }
 0x1a5   : > { %vm2628_vm11 = vcmp.gt.f32.partialorder %v3773_v55, 0.0  ;;  %v2661_v39 = vmul.f32 %v3773_v55, %v4818_v38 }
 0x1a6   : > { %vm2627_vm5 = vcmp.gt.f32.partialorder %v3774_v36, 0.0  ;;  %v2660_v19 = vmul.f32 %v3774_v36, %v4818_v38  ;;  %v4824_v40 = vpop.f32.mrb[18].mxu1  ;;  %v3696_v57 = vpop.f32.mrb[2].mxu0 }
 0x1a7   : > { %v4826_v41 = vsel %vm2628_vm11, %v3773_v55, %v2661_v39  ;;  %v3775_v60 = vadd.f32 %v3696_v57, %v3592_v24  ;;  %v4828_v25 = vpop.f32.mrb[19].mxu1  ;;  %v2445_v53 = vpop.f32.mrb[3].mxu0 }
 0x1a8   : > { %v4830_v2 = vsel %vm2627_vm5, %v3774_v36, %v2660_v19  ;;  %v3776_v26 = vadd.f32 %v2445_v53, %v1794_v23  ;;  %v2757_v3 = vmul.f32 2.0, %v4826_v41 }
 0x1a9   : > { %vm2630_vm0 = vcmp.gt.f32.partialorder %v3775_v60, 0.0  ;;  %v2663_v14 = vmul.f32 %v3775_v60, %v4818_v38  ;;  %v2756_v13 = vmul.f32 2.0, %v4830_v2 }
 0x1aa   : > { %vm2629_vm2 = vcmp.gt.f32.partialorder %v3776_v26, 0.0  ;;  %v2662_v51 = vmul.f32 %v3776_v26, %v4818_v38  ;;  %v3699_v37 = vpop.f32.mrb[4].mxu0 }
 0x1ab   : > { %v2695_v42 = vsel %vm2630_vm0, %v3775_v60, %v2663_v14  ;;  %v3777_v58 = vadd.f32 %v3699_v37, %v3595_v10  ;;  %v2455_v54 = vpop.f32.mrb[5].mxu0 }
 0x1ac   : > { %v2759_v6 = vmul.f32 2.0, %v2695_v42  ;;  %v2789_v18 = vadd.f32 %v2757_v3, %v2695_v42  ;;  %v2694_v0 = vsel %vm2629_vm2, %v3776_v26, %v2662_v51  ;;  %v3778_v27 = vadd.f32 %v2455_v54, %v1804_v52 }
 0x1ad   : > { %v2758_v61 = vmul.f32 2.0, %v2694_v0  ;;  %v2788_v35 = vadd.f32 %v2756_v13, %v2694_v0  ;;  %vm2632_vm11 = vcmp.gt.f32.partialorder %v3777_v58, 0.0  ;;  %v2665_v28 = vmul.f32 %v3777_v58, %v4818_v38 }
 0x1ae   : > { %v2821_v4 = vadd.f32 %v2789_v18, %v2695_v42  ;;  %v2791_v11 = vadd.f32 %v2759_v6, %v4826_v41  ;;  %v2664_v12 = vmul.f32 %v3778_v27, %v4818_v38  ;;  %v3702_v20 = vpop.f32.mrb[6].mxu0  ;;  %vm2631_vm5 = vcmp.gt.f32.partialorder %v3778_v27, 0.0 }
 0x1af   : > { %v4839_v22 = vadd.f32 %v2788_v35, %v2694_v0  ;;  %v2697_v30 = vsel %vm2632_vm11, %v3777_v58, %v2665_v28  ;;  %v3779_v7 = vadd.f32 %v3702_v20, %v3598_v56  ;;  %v2465_v9 = vpop.f32.mrb[7].mxu0  ;;  %v2790_v52 = vadd.f32 %v2758_v61, %v4830_v2 }
 0x1b0   : > { %v2853_v24 = vrot.slane %v2821_v4, 1  ;;  %v2917_v23 = vrot.slane %v2821_v4, 7  ;;  %v2761_v10 = vmul.f32 2.0, %v2697_v30  ;;  %v3013_v8 = vmul.f32 2.0, %v2821_v4 }
 0x1b1   : > { %v2852_v29 = vrot.slane %v4839_v22, 1  ;;  %v2916_v55 = vrot.slane %v4839_v22, 7  ;;  %v2823_v21 = vadd.f32 %v2791_v11, %v2697_v30  ;;  %v2696_v36 = vsel %vm2631_vm5, %v3778_v27, %v2664_v12 }
 0x1b2   : > { %vm2634_vm0 = vcmp.gt.f32.partialorder %v3779_v7, 0.0  ;;  %v2667_v39 = vmul.f32 %v3779_v7, %v4818_v38  ;;  %v2793_v19 = vadd.f32 %v2761_v10, %v2695_v42  ;;  %v3705_v57 = vpop.f32.mrb[8].mxu0  ;;  %v2760_v3 = vmul.f32 2.0, %v2696_v36 }
 0x1b3   : > { %v4847_v56 = vsel %vm969_vm3, %v2852_v29, %v2853_v24  ;;  %v2978_v60 = vsel %vm808_vm8, %v2916_v55, %v2917_v23  ;;  %v2919_v53 = vrot.slane %v2823_v21, 7  ;;  %v2475_v26 = vpop.f32.mrb[9].mxu0  ;;  %v2822_v51 = vadd.f32 %v2790_v52, %v2696_v36 }
 0x1b4   : > { %v3045_v14 = vadd.f32 %v3013_v8, %v2978_v60  ;;  %v2699_v37 = vsel %vm2634_vm0, %v3779_v7, %v2667_v39  ;;  %v3780_v13 = vadd.f32 %v2465_v9, %v4793_v46  ;;  %v3781_v42 = vadd.f32 %v3705_v57, %v4795_v63 }
 0x1b5   : > { %v3782_v58 = vadd.f32 %v2475_v26, %v4797_v15  ;;  %v2854_v54 = vrot.slane %v2822_v51, 1  ;;  %v2763_v6 = vmul.f32 2.0, %v2699_v37  ;;  %v2825_v27 = vadd.f32 %v2793_v19, %v2699_v37 }
 0x1b6   : > { %v3708_v18 = vpop.f32.mrb[10].mxu0  ;;  %vm2633_vm2 = vcmp.gt.f32.partialorder %v3780_v13, 0.0  ;;  %v2666_v61 = vmul.f32 %v3780_v13, %v4818_v38  ;;  %v2792_v35 = vadd.f32 %v2760_v3, %v2694_v0  ;;  %vm2636_vm11 = vcmp.gt.f32.partialorder %v3781_v42, 0.0 }
 0x1b7   : > { %v2485_v28 = vpop.f32.mrb[11].mxu0  ;;  %v2913_v4 = vsel %vm969_vm3, %v2853_v24, %v2854_v54  ;;  %v2857_v12 = vrot.slane %v2825_v27, 1  ;;  %v2921_v20 = vrot.slane %v2825_v27, 7  ;;  %v3017_v46 = vmul.f32 2.0, %v2825_v27 }
 0x1b8   : > { %v3077_v11 = vadd.f32 %v3045_v14, %v2913_v4  ;;  %v2698_v7 = vsel %vm2633_vm2, %v3780_v13, %v2666_v61  ;;  %v2669_v23 = vmul.f32 %v3781_v42, %v4818_v38  ;;  %v2795_v52 = vadd.f32 %v2763_v6, %v2697_v30 }
 0x1b9   : > { %v2762_v15 = vmul.f32 2.0, %v2698_v7  ;;  %v2824_v9 = vadd.f32 %v2792_v35, %v2698_v7  ;;  %vm2635_vm5 = vcmp.gt.f32.partialorder %v3782_v58, 0.0  ;;  %v2668_v0 = vmul.f32 %v3782_v58, %v4818_v38 }
 0x1ba   : > { %v3711_v63 = vpop.f32.mrb[12].mxu0  ;;  %3109 = vst.msk [vmem:[#allocation2 + $0x8] sm:$0xff] %vm1354_vm9, %v3077_v11  ;;  %v2701_v21 = vsel %vm2636_vm11, %v3781_v42, %v2669_v23  ;;  %v3783_v27 = vadd.f32 %v3708_v18, %v4799_v32  ;;  %v3784_v35 = vadd.f32 %v2485_v28, %v4801_v48 }
 0x1bb   : > { %v2495_v10 = vpop.f32.mrb[13].mxu0  ;;  %v2856_v8 = vrot.slane %v2824_v9, 1  ;;  %v2920_v24 = vrot.slane %v2824_v9, 7  ;;  %v3016_v29 = vmul.f32 2.0, %v2824_v9  ;;  %v2765_v39 = vmul.f32 2.0, %v2701_v21 }
 0x1bc   : > { %v2827_v19 = vadd.f32 %v2795_v52, %v2701_v21  ;;  %v2700_v57 = vsel %vm2635_vm5, %v3782_v58, %v2668_v0  ;;  %v2794_v60 = vadd.f32 %v2762_v15, %v2696_v36  ;;  %v3786_v15 = vadd.f32 %v2495_v10, %v4805_v49 }
 0x1bd   : > { %v2910_v14 = vsel %vm969_vm3, %v2856_v8, %v2857_v12  ;;  %v2974_v3 = vsel %vm808_vm8, %v2920_v24, %v2921_v20  ;;  %v2975_v30 = vsel %vm808_vm8, %v2919_v53, %v2920_v24  ;;  %v2764_v36 = vmul.f32 2.0, %v2700_v57 }
 0x1be   : > { %v4862_v26 = vpop.f32.mrb[14].mxu0  ;;  %v2984_v13 = vsel %vm4429_vm14, %v2910_v14, %v2975_v30  ;;  %v3049_v42 = vadd.f32 %v3017_v46, %v2974_v3  ;;  %v2923_v58 = vrot.slane %v2827_v19, 7  ;;  %v2826_v6 = vadd.f32 %v2794_v60, %v2700_v57 }
 0x1bf   : > { %v4870_v51 = vpop.f32.mrb[15].mxu0  ;;  %v3048_v54 = vadd.f32 %v3016_v29, %v2984_v13  ;;  %v2797_v61 = vadd.f32 %v2765_v39, %v2699_v37  ;;  %v2796_v20 = vadd.f32 %v2764_v36, %v2698_v7  ;;  %v3785_v53 = vadd.f32 %v3711_v63, %v4803_v43 }
 0x1c0   : > { %v2858_v62 = vrot.slane %v2826_v6, 1  ;;  %vm2638_vm14 = vcmp.gt.f32.partialorder %v3783_v27, 0.0  ;;  %v2671_v46 = vmul.f32 %v3783_v27, %v4818_v38  ;;  %vm2637_vm0 = vcmp.gt.f32.partialorder %v3784_v35, 0.0 }
 0x1c1   : > { %v3080_v11 = vadd.f32 %v3048_v54, %v2910_v14  ;;  %v2670_v32 = vmul.f32 %v3784_v35, %v4818_v38  ;;  %vm2640_vm2 = vcmp.gt.f32.partialorder %v3785_v53, 0.0  ;;  %v2673_v52 = vmul.f32 %v3785_v53, %v4818_v38 }
 0x1c2   : > { %v3717_v4 = vpop.f32.mrb[16].mxu0  ;;  %v2909_v48 = vsel %vm969_vm3, %v2857_v12, %v2858_v62  ;;  %v2703_v43 = vsel %vm2638_vm14, %v3783_v27, %v2671_v46  ;;  %vm2639_vm11 = vcmp.gt.f32.partialorder %v3786_v15, 0.0  ;;  %v2672_v13 = vmul.f32 %v3786_v15, %v4818_v38 }
 0x1c3   : > { %v2515_v9 = vpop.f32.mrb[17].mxu0  ;;  %3112 = vst.msk [vmem:[#allocation2 + $0x20] sm:$0xff] %vm1354_vm9, %v3080_v11  ;;  %v3081_v18 = vadd.f32 %v3049_v42, %v2909_v48  ;;  %v2767_v49 = vmul.f32 2.0, %v2703_v43  ;;  %v2829_v7 = vadd.f32 %v2797_v61, %v2703_v43  ;;  %v2702_v63 = vsel %vm2637_vm0, %v3784_v35, %v2670_v32 }
 0x1c4   : > { %v2766_v23 = vmul.f32 2.0, %v2702_v63  ;;  %v2828_v10 = vadd.f32 %v2796_v20, %v2702_v63  ;;  %v2705_v60 = vsel %vm2640_vm2, %v3785_v53, %v2673_v52  ;;  %v2704_v20 = vsel %vm2639_vm11, %v3786_v15, %v2672_v13 }
 0x1c5   : > { %3113 = vst.msk [vmem:[#allocation2 + $0x28] sm:$0xff] %vm1354_vm9, %v3081_v18  ;;  %v2861_v0 = vrot.slane %v2829_v7, 1  ;;  %v2925_v8 = vrot.slane %v2829_v7, 7  ;;  %v3021_v24 = vmul.f32 2.0, %v2829_v7  ;;  %v2769_v3 = vmul.f32 2.0, %v2705_v60 }
 0x1c6   : > { %v4883_v37 = vpop.f32.mrb[18].mxu0  ;;  %v2860_v29 = vrot.slane %v2828_v10, 1  ;;  %v2924_v39 = vrot.slane %v2828_v10, 7  ;;  %v3020_v19 = vmul.f32 2.0, %v2828_v10  ;;  %v2799_v30 = vadd.f32 %v2767_v49, %v2701_v21 }
 0x1c7   : > { %v4885_v28 = vpop.f32.mrb[19].mxu0  ;;  %v2798_v42 = vadd.f32 %v2766_v23, %v2700_v57  ;;  %v3787_v57 = vadd.f32 %v4862_v26, %v4807_v1  ;;  %v2801_v53 = vadd.f32 %v2769_v3, %v2703_v43  ;;  %v2768_v32 = vmul.f32 2.0, %v2704_v20 }
 0x1c8   : > { %v2906_v54 = vsel %vm969_vm3, %v2860_v29, %v2861_v0  ;;  %v2970_v36 = vsel %vm808_vm8, %v2924_v39, %v2925_v8  ;;  %v2971_v6 = vsel %vm808_vm8, %v2923_v58, %v2924_v39  ;;  %v2831_v35 = vadd.f32 %v2799_v30, %v2705_v60 }
 0x1c9   : > { %v2988_v27 = vsel %vm4473_vm15, %v2906_v54, %v2971_v6  ;;  %v3053_v61 = vadd.f32 %v3021_v24, %v2970_v36  ;;  %v2830_v58 = vadd.f32 %v2798_v42, %v2704_v20  ;;  %vm2642_vm5 = vcmp.gt.f32.partialorder %v3787_v57, 0.0 }
 0x1ca   : > { %v4889_v12 = vpop.f32.mrb[20].mxu0  ;;  %v3052_v21 = vadd.f32 %v3020_v19, %v2988_v27  ;;  %v2927_v46 = vrot.slane %v2831_v35, 7  ;;  %v2675_v16 = vmul.f32 %v3787_v57, %v4818_v38  ;;  %v3788_v18 = vadd.f32 %v4870_v51, %v4809_v31 }
 0x1cb   : > { %v4892_v14 = vpop.f32.mrb[21].mxu0  ;;  %v2800_v49 = vadd.f32 %v2768_v32, %v2702_v63  ;;  %v3789_v7 = vadd.f32 %v3717_v4, %v4811_v50  ;;  %v3790_v15 = vadd.f32 %v2515_v9, %v4813_v44  ;;  %v2862_v1 = vrot.slane %v2830_v58, 1 }
 0x1cc   : > { %v3084_v48 = vadd.f32 %v3052_v21, %v2906_v54  ;;  %v2707_v26 = vsel %vm2642_vm5, %v3787_v57, %v2675_v16  ;;  %vm2641_vm15 = vcmp.gt.f32.partialorder %v3788_v18, 0.0  ;;  %v2674_v8 = vmul.f32 %v3788_v18, %v4818_v38  ;;  %v3142_v47 = vld [vmem:[#allocation2 + $0x20] ss:$2 sm:$0xff] }
 0x1cd   : > { %v2771_v10 = vmul.f32 2.0, %v2707_v26  ;;  %v2833_v52 = vadd.f32 %v2801_v53, %v2707_v26  ;;  %v2905_v31 = vsel %vm969_vm3, %v2861_v0, %v2862_v1  ;;  %vm2644_vm14 = vcmp.gt.f32.partialorder %v3789_v7, 0.0 }
 0x1ce   : > { %v4903_v11 = vpop.f32.mrb[22].mxu0  ;;  %3116 = vst.msk [vmem:[#allocation2 + $0x40] sm:$0xff] %vm1354_vm9, %v3084_v48  ;;  %v3085_v51 = vadd.f32 %v3053_v61, %v2905_v31  ;;  %v2706_v63 = vsel %vm2641_vm15, %v3788_v18, %v2674_v8  ;;  %v2677_v19 = vmul.f32 %v3789_v7, %v4818_v38  ;;  %vm2643_vm0 = vcmp.gt.f32.partialorder %v3790_v15, 0.0 }
 0x1cf   : > { %v4908_v62 = vpop.f32.mrb[23].mxu0  ;;  %v2865_v50 = vrot.slane %v2833_v52, 1  ;;  %v2929_v44 = vrot.slane %v2833_v52, 7  ;;  %v3025_v9 = vmul.f32 2.0, %v2833_v52  ;;  %v2770_v29 = vmul.f32 2.0, %v2706_v63 }
 0x1d0   : > { %3117 = vst.msk [vmem:[#allocation2 + $0x48] sm:$0xff] %vm1354_vm9, %v3085_v51  ;;  %v2832_v39 = vadd.f32 %v2800_v49, %v2706_v63  ;;  %v2803_v3 = vadd.f32 %v2771_v10, %v2705_v60  ;;  %v2676_v0 = vmul.f32 %v3790_v15, %v4818_v38  ;;  %v2709_v54 = vsel %vm2644_vm14, %v3789_v7, %v2677_v19 }
 0x1d1   : > { %v2773_v27 = vmul.f32 2.0, %v2709_v54  ;;  %v2802_v21 = vadd.f32 %v2770_v29, %v2704_v20  ;;  %v3791_v10 = vadd.f32 %v4883_v37, %v4824_v40  ;;  %v3792_v8 = vadd.f32 %v4885_v28, %v4828_v25 }
 0x1d2   : > { %v4915_v23 = vpop.f32.mrb[24].mxu0  ;;  %v2864_v30 = vrot.slane %v2832_v39, 1  ;;  %v2928_v13 = vrot.slane %v2832_v39, 7  ;;  %v3024_v42 = vmul.f32 2.0, %v2832_v39  ;;  %v2835_v61 = vadd.f32 %v2803_v3, %v2709_v54 }
 0x1d3   : > { %v4918_v43 = vpop.f32.mrb[25].mxu0  ;;  %v2708_v35 = vsel %vm2643_vm0, %v3790_v15, %v2676_v0  ;;  %v2805_v52 = vadd.f32 %v2773_v27, %v2707_v26  ;;  %v2679_v39 = vmul.f32 %v3791_v10, %v4818_v38  ;;  %vm2645_vm2 = vcmp.gt.f32.partialorder %v3792_v8, 0.0 }
 0x1d4   : > { %v2902_v60 = vsel %vm969_vm3, %v2864_v30, %v2865_v50  ;;  %v2966_v32 = vsel %vm808_vm8, %v2928_v13, %v2929_v44  ;;  %v2967_v48 = vsel %vm808_vm8, %v2927_v46, %v2928_v13  ;;  %v2931_v49 = vrot.slane %v2835_v61, 7 }
 0x1d5   : > { %v2992_v58 = vsel %vm4517_vm4, %v2902_v60, %v2967_v48  ;;  %v3057_v16 = vadd.f32 %v3025_v9, %v2966_v32  ;;  %v2772_v7 = vmul.f32 2.0, %v2708_v35  ;;  %v2834_v1 = vadd.f32 %v2802_v21, %v2708_v35 }
 0x1d6   : > { %v4923_v4 = vpop.f32.mrb[26].mxu0  ;;  %v3056_v18 = vadd.f32 %v3024_v42, %v2992_v58  ;;  %vm2646_vm4 = vcmp.gt.f32.partialorder %v3791_v10, 0.0  ;;  %v2678_v40 = vmul.f32 %v3792_v8, %v4818_v38 }
 0x1d7   : > { %v4925_v24 = vpop.f32.mrb[27].mxu0  ;;  %v2804_v51 = vadd.f32 %v2772_v7, %v2706_v63  ;;  %v2866_v29 = vrot.slane %v2834_v1, 1  ;;  %v2711_v63 = vsel %vm2646_vm4, %v3791_v10, %v2679_v39 }
 0x1d8   : > { %v3088_v45 = vadd.f32 %v3056_v18, %v2902_v60  ;;  %v2837_v19 = vadd.f32 %v2805_v52, %v2711_v63 }
 0x1d9   : > { %v2901_v37 = vsel %vm969_vm3, %v2865_v50, %v2866_v29 }
 0x1da   : > { %v3671_v36 = vpop.f32.mrb[20].mxu1  ;;  %v4930_v6 = vpop.f32.mrb[28].mxu0  ;;  %3120 = vst.msk [vmem:[#allocation2 + $0x60] sm:$0xff] %vm1354_vm9, %v3088_v45  ;;  %v3089_v26 = vadd.f32 %v3057_v16, %v2901_v37  ;;  %v2869_v42 = vrot.slane %v2837_v19, 1  ;;  %v3029_v27 = vmul.f32 2.0, %v2837_v19 }
 0x1db   : > { %v2208_v57 = vpop.f32.mrb[21].mxu1  ;;  %v4932_v53 = vpop.f32.mrb[29].mxu0  ;;  %v3793_v44 = vadd.f32 %v4889_v12, %v3671_v36  ;;  %v2775_v12 = vmul.f32 2.0, %v2711_v63  ;;  %v2933_v36 = vrot.slane %v2837_v19, 7 }
 0x1dc   : > { %v3794_v9 = vadd.f32 %v4892_v14, %v2208_v57  ;;  %v2710_v14 = vsel %vm2645_vm2, %v3792_v8, %v2678_v40  ;;  %3121 = vst.msk [vmem:[#allocation2 + $0x68] sm:$0xff] %vm1354_vm9, %v3089_v26 }
 0x1dd   : > { %vm2648_vm11 = vcmp.gt.f32.partialorder %v3793_v44, 0.0  ;;  %v2774_v3 = vmul.f32 2.0, %v2710_v14  ;;  %v2836_v0 = vadd.f32 %v2804_v51, %v2710_v14  ;;  %v2681_v30 = vmul.f32 %v3793_v44, %v4818_v38 }
 0x1de   : > { %v3674_v20 = vpop.f32.mrb[22].mxu1  ;;  %v4942_v15 = vpop.f32.mrb[30].mxu0  ;;  %vm2647_vm5 = vcmp.gt.f32.partialorder %v3794_v9, 0.0  ;;  %v2807_v48 = vadd.f32 %v2775_v12, %v2709_v54  ;;  %v2680_v58 = vmul.f32 %v3794_v9, %v4818_v38 }
 0x1df   : > { %v2218_v31 = vpop.f32.mrb[23].mxu1  ;;  %v4948_v46 = vpop.f32.mrb[31].mxu0  ;;  %v2868_v50 = vrot.slane %v2836_v0, 1  ;;  %v2932_v21 = vrot.slane %v2836_v0, 7  ;;  %v3028_v57 = vmul.f32 2.0, %v2836_v0  ;;  %v2713_v60 = vsel %vm2648_vm11, %v3793_v44, %v2681_v30 }
 0x1e0   : > { %v2777_v32 = vmul.f32 2.0, %v2713_v60  ;;  %v2806_v16 = vadd.f32 %v2774_v3, %v2708_v35  ;;  %v2839_v45 = vadd.f32 %v2807_v48, %v2713_v60  ;;  %v2712_v35 = vsel %vm2647_vm5, %v3794_v9, %v2680_v58 }
 0x1e1   : > { %v2898_v18 = vsel %vm969_vm3, %v2868_v50, %v2869_v42  ;;  %v2962_v7 = vsel %vm808_vm8, %v2932_v21, %v2933_v36  ;;  %v2963_v1 = vsel %vm808_vm8, %v2931_v49, %v2932_v21  ;;  %v3795_v44 = vadd.f32 %v4903_v11, %v3674_v20 }
 0x1e2   : > { %v3677_v25 = vpop.f32.mrb[24].mxu1  ;;  %v2996_v52 = vsel %vm4561_vm6, %v2898_v18, %v2963_v1  ;;  %v3061_v8 = vadd.f32 %v3029_v27, %v2962_v7  ;;  %v2809_v29 = vadd.f32 %v2777_v32, %v2711_v63  ;;  %v2935_v39 = vrot.slane %v2839_v45, 7 }
 0x1e3   : > { %v2228_v28 = vpop.f32.mrb[25].mxu1  ;;  %v3060_v51 = vadd.f32 %v3028_v57, %v2996_v52  ;;  %v2776_v40 = vmul.f32 2.0, %v2712_v35  ;;  %v2838_v26 = vadd.f32 %v2806_v16, %v2712_v35  ;;  %vm2650_vm15 = vcmp.gt.f32.partialorder %v3795_v44, 0.0  ;;  %v3146_v5 = vld [vmem:[#allocation2 + $0x60] ss:$2 sm:$0xff] }
 0x1e4   : > { %v2683_v49 = vmul.f32 %v3795_v44, %v4818_v38  ;;  %v3796_v59 = vadd.f32 %v4908_v62, %v2218_v31  ;;  %v3797_v3 = vadd.f32 %v4915_v23, %v3677_v25  ;;  %v3798_v0 = vadd.f32 %v4918_v43, %v2228_v28 }
 0x1e5   : > { %v3092_v37 = vadd.f32 %v3060_v51, %v2898_v18  ;;  %v2808_v19 = vadd.f32 %v2776_v40, %v2710_v14  ;;  %v2870_v11 = vrot.slane %v2838_v26, 1 }
 0x1e6   : > { %v4959_v13 = vpop.f32.mrb[26].mxu1  ;;  %v2715_v20 = vsel %vm2650_vm15, %v3795_v44, %v2683_v49  ;;  %vm2649_vm6 = vcmp.gt.f32.partialorder %v3796_v59, 0.0  ;;  %v2682_v36 = vmul.f32 %v3796_v59, %v4818_v38  ;;  %vm2652_vm14 = vcmp.gt.f32.partialorder %v3797_v3, 0.0 }
 0x1e7   : > { %v4961_v61 = vpop.f32.mrb[27].mxu1  ;;  %3124 = vst.msk [vmem:[#allocation2 + $0x80] sm:$0xff] %vm1354_vm9, %v3092_v37  ;;  %v2779_v63 = vmul.f32 2.0, %v2715_v20  ;;  %v2841_v30 = vadd.f32 %v2809_v29, %v2715_v20  ;;  %v2897_v27 = vsel %vm969_vm3, %v2869_v42, %v2870_v11  ;;  %v2685_v50 = vmul.f32 %v3797_v3, %v4818_v38 }
 0x1e8   : > { %v3093_v62 = vadd.f32 %v3061_v8, %v2897_v27  ;;  %v2714_v25 = vsel %vm2649_vm6, %v3796_v59, %v2682_v36  ;;  %vm2651_vm0 = vcmp.gt.f32.partialorder %v3798_v0, 0.0  ;;  %v2684_v57 = vmul.f32 %v3798_v0, %v4818_v38 }
 0x1e9   : > { %v2873_v31 = vrot.slane %v2841_v30, 1  ;;  %v2937_v14 = vrot.slane %v2841_v30, 7  ;;  %v3033_v23 = vmul.f32 2.0, %v2841_v30  ;;  %v2778_v43 = vmul.f32 2.0, %v2714_v25 }
 0x1ea   : > { %v4971_v10 = vpop.f32.mrb[28].mxu1  ;;  %3125 = vst.msk [vmem:[#allocation2 + $0x88] sm:$0xff] %vm1354_vm9, %v3093_v62  ;;  %v2840_v28 = vadd.f32 %v2808_v19, %v2714_v25  ;;  %v2811_v21 = vadd.f32 %v2779_v63, %v2713_v60  ;;  %v2717_v42 = vsel %vm2652_vm14, %v3797_v3, %v2685_v50  ;;  %v2716_v7 = vsel %vm2651_vm0, %v3798_v0, %v2684_v57 }
 0x1eb   : > { %v2248_v54 = vpop.f32.mrb[29].mxu1  ;;  %v2781_v16 = vmul.f32 2.0, %v2717_v42  ;;  %v2810_v1 = vadd.f32 %v2778_v43, %v2712_v35  ;;  %v2780_v40 = vmul.f32 2.0, %v2716_v7  ;;  %v3799_v35 = vadd.f32 %v4923_v4, %v4959_v13 }
 0x1ec   : > { %v2872_v32 = vrot.slane %v2840_v28, 1  ;;  %v2936_v48 = vrot.slane %v2840_v28, 7  ;;  %v3032_v58 = vmul.f32 2.0, %v2840_v28  ;;  %v2843_v18 = vadd.f32 %v2811_v21, %v2717_v42 }
 0x1ed   : > { %v2842_v37 = vadd.f32 %v2810_v1, %v2716_v7  ;;  %v2813_v26 = vadd.f32 %v2781_v16, %v2715_v20  ;;  %v3800_v49 = vadd.f32 %v4925_v24, %v4961_v61  ;;  %v2812_v19 = vadd.f32 %v2780_v40, %v2714_v25 }
 0x1ee   : > { %v4978_v12 = vpop.f32.mrb[30].mxu1  ;;  %v2894_v52 = vsel %vm969_vm3, %v2872_v32, %v2873_v31  ;;  %v2958_v8 = vsel %vm808_vm8, %v2936_v48, %v2937_v14  ;;  %v2959_v60 = vsel %vm808_vm8, %v2935_v39, %v2936_v48  ;;  %v2939_v29 = vrot.slane %v2843_v18, 7 }
 0x1ef   : > { %v4983_v9 = vpop.f32.mrb[31].mxu1  ;;  %v3000_v45 = vsel %vm4609_vm13, %v2894_v52, %v2959_v60  ;;  %v3065_v51 = vadd.f32 %v3033_v23, %v2958_v8  ;;  %v3801_v39 = vadd.f32 %v4930_v6, %v4971_v10  ;;  %v3802_v33 = vadd.f32 %v4932_v53, %v2248_v54 }
 0x1f0   : > { %v3064_v44 = vadd.f32 %v3032_v58, %v3000_v45  ;;  %v2874_v3 = vrot.slane %v2842_v37, 1  ;;  %vm2654_vm13 = vcmp.gt.f32.partialorder %v3799_v35, 0.0  ;;  %v2687_v0 = vmul.f32 %v3799_v35, %v4818_v38 }
 0x1f1   : > { %vm2653_vm4 = vcmp.gt.f32.partialorder %v3800_v49, 0.0  ;;  %v2686_v4 = vmul.f32 %v3800_v49, %v4818_v38  ;;  %vm2656_vm2 = vcmp.gt.f32.partialorder %v3801_v39, 0.0  ;;  %v2689_v54 = vmul.f32 %v3801_v39, %v4818_v38 }
 0x1f2   : > { %v3096_v59 = vadd.f32 %v3064_v44, %v2894_v52  ;;  %v2893_v24 = vsel %vm969_vm3, %v2873_v31, %v2874_v3  ;;  %v2719_v61 = vsel %vm2654_vm13, %v3799_v35, %v2687_v0  ;;  %vm2655_vm11 = vcmp.gt.f32.partialorder %v3802_v33, 0.0 }
 0x1f3   : > { %v3097_v13 = vadd.f32 %v3065_v51, %v2893_v24  ;;  %v2783_v11 = vmul.f32 2.0, %v2719_v61  ;;  %v2845_v20 = vadd.f32 %v2813_v26, %v2719_v61  ;;  %v2718_v6 = vsel %vm2653_vm4, %v3800_v49, %v2686_v4 }
 0x1f4   : > { %3128 = vst.msk [vmem:[#allocation2 + $0xa0] sm:$0xff] %vm1354_vm9, %v3096_v59  ;;  %v2782_v53 = vmul.f32 2.0, %v2718_v6  ;;  %v2844_v10 = vadd.f32 %v2812_v19, %v2718_v6  ;;  %v2721_v31 = vsel %vm2656_vm2, %v3801_v39, %v2689_v54  ;;  %v2688_v43 = vmul.f32 %v3802_v33, %v4818_v38 }
 0x1f5   : > { %3129 = vst.msk [vmem:[#allocation2 + $0xa8] sm:$0xff] %vm1354_vm9, %v3097_v13  ;;  %v2877_v63 = vrot.slane %v2845_v20, 1  ;;  %v2941_v30 = vrot.slane %v2845_v20, 7  ;;  %v3037_v36 = vmul.f32 2.0, %v2845_v20  ;;  %v2785_v23 = vmul.f32 2.0, %v2721_v31 }
 0x1f6   : > { %v2876_v27 = vrot.slane %v2844_v10, 1  ;;  %v2940_v62 = vrot.slane %v2844_v10, 7  ;;  %v3036_v14 = vmul.f32 2.0, %v2844_v10  ;;  %v2815_v25 = vadd.f32 %v2783_v11, %v2717_v42 }
 0x1f7   : > { %v2814_v28 = vadd.f32 %v2782_v53, %v2716_v7  ;;  %v2720_v42 = vsel %vm2655_vm11, %v3802_v33, %v2688_v43  ;;  %v3803_v18 = vadd.f32 %v4942_v15, %v4978_v12  ;;  %v2817_v7 = vadd.f32 %v2785_v23, %v2719_v61 }
 0x1f8   : > { %v2890_v50 = vsel %vm969_vm3, %v2876_v27, %v2877_v63  ;;  %v2954_v21 = vsel %vm808_vm8, %v2940_v62, %v2941_v30  ;;  %v2955_v57 = vsel %vm808_vm8, %v2939_v29, %v2940_v62  ;;  %v2847_v58 = vadd.f32 %v2815_v25, %v2721_v31  ;;  %v3148_v62 = vld [vmem:[#allocation2 + $0x80] ss:$2 sm:$0xff] }
 0x1f9   : > { %v3004_v32 = vsel %vm4669_vm1, %v2890_v50, %v2955_v57  ;;  %v3069_v48 = vadd.f32 %v3037_v36, %v2954_v21  ;;  %v2784_v52 = vmul.f32 2.0, %v2720_v42  ;;  %v2846_v60 = vadd.f32 %v2814_v28, %v2720_v42 }
 0x1fa   : > { %v3068_v16 = vadd.f32 %v3036_v14, %v3004_v32  ;;  %v2943_v1 = vrot.slane %v2847_v58, 7  ;;  %vm2658_vm5 = vcmp.gt.f32.partialorder %v3803_v18, 0.0  ;;  %v2691_v45 = vmul.f32 %v3803_v18, %v4818_v38 }
 0x1fb   : > { %v3804_v17 = vadd.f32 %v4948_v46, %v4983_v9  ;;  %v2816_v51 = vadd.f32 %v2784_v52, %v2718_v6  ;;  %v2878_v44 = vrot.slane %v2846_v60, 1  ;;  %v3012_v3 = vmul.f32 2.0, %v4839_v22 }
 0x1fc   : > { %v3100_v8 = vadd.f32 %v3068_v16, %v2890_v50  ;;  %v2723_v29 = vsel %vm2658_vm5, %v3803_v18, %v2691_v45  ;;  %v3150_v14 = vld [vmem:[#allocation2 + $0xa0] ss:$2 sm:$0xff] }
 0x1fd   : > { %v2787_v40 = vmul.f32 2.0, %v2723_v29  ;;  %v2849_v37 = vadd.f32 %v2817_v7, %v2723_v29  ;;  %vm2657_vm1 = vcmp.gt.f32.partialorder %v3804_v17, 0.0  ;;  %v2690_v15 = vmul.f32 %v3804_v17, %v4818_v38 }
 0x1fe   : > { %3132 = vst.msk [vmem:[#allocation2 + $0xc0] sm:$0xff] %vm1354_vm9, %v3100_v8  ;;  %v2889_v12 = vsel %vm969_vm3, %v2877_v63, %v2878_v44 }
 0x1ff   : > { %v3101_v35 = vadd.f32 %v3069_v48, %v2889_v12  ;;  %v2819_v26 = vadd.f32 %v2787_v40, %v2721_v31  ;;  %v2722_v46 = vsel %vm2657_vm1, %v3804_v17, %v2690_v15  ;;  %v2881_v9 = vrot.slane %v2849_v37, 1 }
 0x200   : > { %v2786_v59 = vmul.f32 2.0, %v2722_v46  ;;  %v2848_v19 = vadd.f32 %v2816_v51, %v2722_v46  ;;  %v2945_v39 = vrot.slane %v2849_v37, 7  ;;  %v3041_v13 = vmul.f32 2.0, %v2849_v37 }
 0x201   : > { %3133 = vst.msk [vmem:[#allocation2 + $0xc8] sm:$0xff] %vm1354_vm9, %v3101_v35  ;;  %v2851_v49 = vadd.f32 %v2819_v26, %v4826_v41 }
 0x202   : > { %v2818_v0 = vadd.f32 %v2786_v59, %v2720_v42  ;;  %v2880_v4 = vrot.slane %v2848_v19, 1  ;;  %v2944_v38 = vrot.slane %v2848_v19, 7  ;;  %v3040_v61 = vmul.f32 2.0, %v2848_v19 }
 0x203   : > { %v2947_v33 = vrot.slane %v2851_v49, 7 }
 0x204   : > { %v2850_v11 = vadd.f32 %v2818_v0, %v4830_v2  ;;  %v2886_v20 = vsel %vm969_vm3, %v2880_v4, %v2881_v9  ;;  %v2950_v53 = vsel %vm808_vm8, %v2944_v38, %v2945_v39  ;;  %v2951_v22 = vsel %vm808_vm8, %v2943_v1, %v2944_v38 }
 0x205   : > { %v2979_v24 = vsel %vm808_vm8, %v2947_v33, %v2916_v55  ;;  %v3008_v55 = vsel %vm4724_vm12, %v2886_v20, %v2951_v22  ;;  %v3073_v63 = vadd.f32 %v3041_v13, %v2950_v53 }
 0x206   : > { %v2980_v41 = vsel %vm4360_vm7, %v4847_v56, %v2979_v24  ;;  %v2882_v10 = vrot.slane %v2850_v11, 1  ;;  %v3072_v34 = vadd.f32 %v3040_v61, %v3008_v55 }
 0x207   : > { %v3044_v6 = vadd.f32 %v3012_v3, %v2980_v41 }
 0x208   : > { %v2885_v2 = vsel %vm969_vm3, %v2881_v9, %v2882_v10  ;;  %v3104_v30 = vadd.f32 %v3072_v34, %v2886_v20  ;;  %v3152_v31 = vld [vmem:[#allocation2 + $0xc0] ss:$2 sm:$0xff] }
 0x209   : > { %v3076_v54 = vadd.f32 %v3044_v6, %v4847_v56  ;;  %v3105_v36 = vadd.f32 %v3073_v63, %v2885_v2  ;;  %v3144_v56 = vld [vmem:[#allocation2 + $0x40] ss:$2 sm:$0xff] }
 0x20a   : > { %3136 = vst.msk [vmem:[#allocation2 + $0xe0] sm:$0xff] %vm1354_vm9, %v3104_v30 }
 0x20b   : > { %3108 = vst.msk [vmem:[#allocation2] sm:$0xff] %vm1354_vm9, %v3076_v54  ;;  %3137 = vst.msk [vmem:[#allocation2 + $0xe8] sm:$0xff] %vm1354_vm9, %v3105_v36 }
 0x212   : > { %v3140_v27 = vld [vmem:[#allocation2] ss:$2 sm:$0xff] }
 0x213   : > { %3741 = vmatprep.mubr.msk.f32.mxu1 %vm1354_vm9, %v3140_v27  ;;  %v3154_v23 = vld [vmem:[#allocation2 + $0xe0] ss:$2 sm:$0xff] }
 0x214   : > { %3742 = vmatmul.mubr.msk.f32.vlgmr.msra.gmra.mrb[32].mxu1 %vm1354_vm9, %v3142_v47 }
 0x215   : > { %3744 = vmatprep.mubr.msk.f32.mxu1 %vm1354_vm9, %v3144_v56 }
 0x218   : > { %3745 = vmatmul.mubr.msk.f32.gmra.mrb[34].mxu1 %vm1354_vm9, %v3146_v5 }
 0x219   : > { %3747 = vmatprep.mubr.msk.f32.mxu1 %vm1354_vm9, %v3148_v62 }
 0x21c   : > { %3748 = vmatmul.mubr.msk.f32.gmra.mrb[36].mxu1 %vm1354_vm9, %v3150_v14 }
 0x21d   : > { %3750 = vmatprep.mubr.msk.f32.mxu1 %vm1354_vm9, %v3152_v31 }
 0x220   : > { %3751 = vmatmul.mubr.msk.f32.gmra.mrb[38].mxu1 %vm1354_vm9, %v3154_v23 }
 0x2e7   : > { %v3743_v25 = vpop.f32.mrb[32].mxu1 }
 0x2e8   : > { %3289 = vst.msk [vmem:[%s198_s16 + $0x8] sm:$0xff] %vm1387_vm10, %v3743_v25  ;;  %v3249_v43 = vpop.f32.mrb[33].mxu1 }
 0x2e9   : > { %3288 = vst.msk [vmem:[%s198_s16] sm:$0xff] %vm1387_vm10, %v3249_v43 }
 0x2eb   : > { %v3746_v28 = vpop.f32.mrb[34].mxu1 }
 0x2ec   : > { %3291 = vst.msk [vmem:[%s198_s16 + $0x18] sm:$0xff] %vm1387_vm10, %v3746_v28  ;;  %v3259_v50 = vpop.f32.mrb[35].mxu1 }
 0x2ed   : > { %3290 = vst.msk [vmem:[%s198_s16 + $0x10] sm:$0xff] %vm1387_vm10, %v3259_v50 }
 0x2ef   : > { %v3749_v21 = vpop.f32.mrb[36].mxu1 }
 0x2f0   : > { %3293 = vst.msk [vmem:[%s198_s16 + $0x28] sm:$0xff] %vm1387_vm10, %v3749_v21  ;;  %v3269_v57 = vpop.f32.mrb[37].mxu1 }
 0x2f1   : > { %3292 = vst.msk [vmem:[%s198_s16 + $0x20] sm:$0xff] %vm1387_vm10, %v3269_v57 }
 0x2f3   : > { %v3752_v32 = vpop.f32.mrb[38].mxu1 }
 0x2f4   : > { %3295 = vst.msk [vmem:[%s198_s16 + $0x38] sm:$0xff] %vm1387_vm10, %v3752_v32  ;;  %v3279_v48 = vpop.f32.mrb[39].mxu1 }
 0x2f5   : > { %3294 = vst.msk [vmem:[%s198_s16 + $0x30] sm:$0xff] %vm1387_vm10, %v3279_v48 }
 0x2f6 PF: > { %s15_s17 = sadd.s32 1, %s3855_s17  }
 0x2f7   : > { %p12_p4 = scmp.ge.s32.totalorder %s15_s17, 4  }
 0x2f9   :  { %14 = sbr.rel (!%p12_p4) target bundleno = 2 (0x2), region = 75 }

</bundles_post_ra>
